<compile_context>
chip_gen: v6e
topology: v6e:2x2x1
jax: 0.10.0
libtpu: 0.0.40
codegen_flags: <defaults>
</compile_context>

<pallas_src>
import jax
import jax.numpy as jnp
import numpy as np
from jax.experimental import pallas as pl
from jax.experimental.pallas import tpu as pltpu

CIN, COUT, H, W, K = 2, 3, 64, 64, 3
LANES = 2 * W          # 128: ch0 in lanes [0, W), ch1 in lanes [W, 2W)
SCRATCH_ROWS = H + 8   # 72, explicit sublane multiple (>= H + 2 halo rows)
SUB_CONST = 5.94


def conv_sub_kernel(x_ref, w_ref, b_ref, o_ref, xp_ref):
    """3x3 conv (stride 1, padding 1) fused with the `- 5.94` subtraction.

    x_ref  : (1, CIN, H, W)        f32  VMEM   un-padded input image
    w_ref  : (COUT*CIN*K*K,)       f32  SMEM   conv weights, flattened OIHW
    b_ref  : (COUT,)               f32  SMEM   bias with -5.94 already folded in
    o_ref  : (COUT, H, 2W)         f32  VMEM   lane-dense result (lanes >= W duplicate)
    xp_ref : (SCRATCH_ROWS, 2W)    f32  VMEM   channel-packed image + vertical halo
    """
    # --- Build the channel-packed image: rows 1..H hold the image, rows 0 / H+1 are
    # --- the only halo that exists (no lane halo columns in the packed layout).
    xp_ref[0:1, :] = jnp.zeros((1, LANES), dtype=jnp.float32)          # top halo row
    xp_ref[H + 1:H + 2, :] = jnp.zeros((1, LANES), dtype=jnp.float32)  # bottom halo row
    xp_ref[1:H + 1, 0:W] = x_ref[0, 0]          # ch0 -> lanes 0..W-1   (lane-aligned)
    xp_ref[1:H + 1, W:LANES] = x_ref[0, 1]      # ch1 -> lanes W..2W-1

    # --- Hoisted (1, 128) lane masks (seam masking + per-channel weight rows).
    lane = jax.lax.broadcasted_iota(jnp.int32, (1, LANES), 1)
    lane_in_ch = jnp.bitwise_and(lane, W - 1)   # lane index within each channel half
    first_half = lane < W                       # ch0 lanes
    left_seam = lane_in_ch == 0                 # lanes 0 and W      (kx = 0 taps)
    right_seam = lane_in_ch == (W - 1)          # lanes W-1 and 2W-1 (kx = 2 taps)

    # --- 9 shifted tap planes (instead of 18), each reused for all 3 output channels.
    accs = [None] * COUT
    for ky in range(K):
        pv = xp_ref[ky:ky + H, :]               # (H, 2W): vertical shift via halo rows
        for kx in range(K):
            if kx == 0:      # needs image col x-1: shift right one lane, zero the seam
                plane = jnp.where(left_seam, 0.0, pltpu.roll(pv, 1, axis=1))
            elif kx == 2:    # needs image col x+1: shift left one lane, zero the seam
                plane = jnp.where(right_seam, 0.0, pltpu.roll(pv, LANES - 1, axis=1))
            else:            # center tap: lane-aligned, no shift
                plane = pv
            for co in range(COUT):
                w0 = w_ref[((co * CIN + 0) * K + ky) * K + kx]
                w1 = w_ref[((co * CIN + 1) * K + ky) * K + kx]
                wrow = jnp.where(first_half, w0, w1)      # (1, 2W) lane-weight row
                term = plane * wrow
                accs[co] = term if accs[co] is None else accs[co] + term

    # --- Fold ch0/ch1 halves with one XLU roll per channel, add (bias - 5.94),
    # --- store full 128-lane rows (lanes >= W hold a harmless duplicate).
    for co in range(COUT):
        folded = accs[co] + pltpu.roll(accs[co], W, axis=1)
        o_ref[co] = folded + b_ref[co]


@jax.jit
def conv_sub(x, weight, bias):
    """x: (1, CIN, H, W); weight: (COUT, CIN, K, K); bias: (COUT,)."""
    w_flat = weight.astype(jnp.float32).reshape(-1)      # (54,) scalar table -> SMEM
    b_fold = bias.astype(jnp.float32) - SUB_CONST        # fold the constant into bias

    out_packed = pl.pallas_call(
        conv_sub_kernel,
        out_shape=jax.ShapeDtypeStruct((COUT, H, LANES), jnp.float32),
        in_specs=[
            pl.BlockSpec(memory_space=pltpu.MemorySpace.VMEM),   # image
            pl.BlockSpec(memory_space=pltpu.MemorySpace.SMEM),   # weights
            pl.BlockSpec(memory_space=pltpu.MemorySpace.SMEM),   # bias
        ],
        out_specs=pl.BlockSpec(memory_space=pltpu.MemorySpace.VMEM),
        scratch_shapes=[pltpu.VMEM((SCRATCH_ROWS, LANES), jnp.float32)],
        cost_estimate=pl.CostEstimate(
            flops=2 * COUT * CIN * K * K * H * W,
            transcendentals=0,
            bytes_accessed=(1 * CIN * H * W + COUT * CIN * K * K + COUT
                            + COUT * H * LANES) * 4,
        ),
    )(x.astype(jnp.float32), w_flat, b_fold)

    # Layout plumbing only: drop the duplicated lanes, restore (1, COUT, H, W).
    return out_packed[:, :, :W].reshape(1, COUT, H, W)


def reference(x, weight, bias):
    y = jax.lax.conv_general_dilated(
        x, weight,
        window_strides=(1, 1),
        padding=((1, 1), (1, 1)),
        dimension_numbers=("NCHW", "OIHW", "NCHW"),
    )
    return y + bias[None, :, None, None] - SUB_CONST


if __name__ == "__main__":
    key = jax.random.PRNGKey(0)
    k_x, k_w, k_b = jax.random.split(key, 3)

    # Deterministic parameter init matching Conv2d(2, 3, 3) shapes.
    fan_in = CIN * K * K
    bound = 1.0 / np.sqrt(fan_in)
    weight = jax.random.uniform(k_w, (COUT, CIN, K, K), jnp.float32, -bound, bound)
    bias = jax.random.uniform(k_b, (COUT,), jnp.float32, -bound, bound)

    x = jax.random.normal(k_x, (1, CIN, H, W), jnp.float32)

    out = jax.block_until_ready(conv_sub(x, weight, bias))

    ref = jax.block_until_ready(reference(x, weight, bias))
    assert out.shape == (1, COUT, H, W)
    np.testing.assert_allclose(np.asarray(out), np.asarray(ref), rtol=1e-4, atol=1e-4)

    print("KERNEL_OK")
</pallas_src>

<mosaic_0001>
module attributes {stable_mosaic.version = 11 : i64} {
  func.func @conv_sub_kernel(%arg0: memref<1x2x64x64xf32, #tpu.memory_space<vmem>>, %arg1: memref<54xf32, #tpu.memory_space<smem>>, %arg2: memref<3xf32, #tpu.memory_space<smem>>, %arg3: memref<3x64x128xf32, #tpu.memory_space<vmem>>, %arg4: memref<72x128xf32, #tpu.memory_space<vmem>>) attributes {dimension_semantics = [], scalar_prefetch = 0 : i64, scratch_operands = 1 : i64, tpu.core_type = #tpu.core_type<tc>} {
    %cst = arith.constant 0.000000e+00 : f32
    %0 = vector.broadcast %cst : f32 to vector<1x128xf32>
    %c0 = arith.constant 0 : index
    %c0_0 = arith.constant 0 : index
    %1 = vector.load %arg4[%c0, %c0_0] : memref<72x128xf32, #tpu.memory_space<vmem>>, vector<1x128xf32>
    tpu.vector_store %arg4[%c0, %c0_0], %0 {strides = array<i32>} : memref<72x128xf32, #tpu.memory_space<vmem>>, vector<1x128xf32>,
    %cst_1 = arith.constant 0.000000e+00 : f32
    %2 = vector.broadcast %cst_1 : f32 to vector<1x128xf32>
    %c65 = arith.constant 65 : index
    %c0_2 = arith.constant 0 : index
    %3 = vector.load %arg4[%c65, %c0_2] : memref<72x128xf32, #tpu.memory_space<vmem>>, vector<1x128xf32>
    tpu.vector_store %arg4[%c65, %c0_2], %2 {strides = array<i32>} : memref<72x128xf32, #tpu.memory_space<vmem>>, vector<1x128xf32>,
    %c0_3 = arith.constant 0 : index
    %c0_4 = arith.constant 0 : index
    %c0_5 = arith.constant 0 : index
    %c0_6 = arith.constant 0 : index
    %4 = vector.load %arg0[%c0_3, %c0_4, %c0_5, %c0_6] : memref<1x2x64x64xf32, #tpu.memory_space<vmem>>, vector<1x1x64x64xf32>
    %5 = vector.shape_cast %4 : vector<1x1x64x64xf32> to vector<64x64xf32>
    %c1 = arith.constant 1 : index
    %c0_7 = arith.constant 0 : index
    %6 = vector.load %arg4[%c1, %c0_7] : memref<72x128xf32, #tpu.memory_space<vmem>>, vector<64x64xf32>
    tpu.vector_store %arg4[%c1, %c0_7], %5 {strides = array<i32>} : memref<72x128xf32, #tpu.memory_space<vmem>>, vector<64x64xf32>,
    %c0_8 = arith.constant 0 : index
    %c1_9 = arith.constant 1 : index
    %c0_10 = arith.constant 0 : index
    %c0_11 = arith.constant 0 : index
    %7 = vector.load %arg0[%c0_8, %c1_9, %c0_10, %c0_11] : memref<1x2x64x64xf32, #tpu.memory_space<vmem>>, vector<1x1x64x64xf32>
    %8 = vector.shape_cast %7 : vector<1x1x64x64xf32> to vector<64x64xf32>
    %c1_12 = arith.constant 1 : index
    %c64 = arith.constant 64 : index
    %9 = vector.load %arg4[%c1_12, %c64] : memref<72x128xf32, #tpu.memory_space<vmem>>, vector<64x64xf32>
    tpu.vector_store %arg4[%c1_12, %c64], %8 {strides = array<i32>} : memref<72x128xf32, #tpu.memory_space<vmem>>, vector<64x64xf32>,
    %10 = tpu.iota {dimensions = array<i32: 1>} : vector<1x128xi32>
    %c63_i32 = arith.constant 63 : i32
    %11 = vector.broadcast %c63_i32 : i32 to vector<1x128xi32>
    %12 = arith.andi %10, %11 : vector<1x128xi32>
    %c64_i32 = arith.constant 64 : i32
    %13 = vector.broadcast %c64_i32 : i32 to vector<1x128xi32>
    %14 = arith.cmpi slt, %10, %13 : vector<1x128xi32>
    %c0_i32 = arith.constant 0 : i32
    %15 = vector.broadcast %c0_i32 : i32 to vector<1x128xi32>
    %16 = arith.cmpi eq, %12, %15 : vector<1x128xi32>
    %c63_i32_13 = arith.constant 63 : i32
    %17 = vector.broadcast %c63_i32_13 : i32 to vector<1x128xi32>
    %18 = arith.cmpi eq, %12, %17 : vector<1x128xi32>
    %c0_14 = arith.constant 0 : index
    %c0_15 = arith.constant 0 : index
    %19 = vector.load %arg4[%c0_14, %c0_15] : memref<72x128xf32, #tpu.memory_space<vmem>>, vector<64x128xf32>
    %c1_i32 = arith.constant 1 : i32
    %20 = tpu.dynamic_rotate %19 by %c1_i32 dim 1 : vector<64x128xf32>, i32 -> vector<64x128xf32>
    %cst_16 = arith.constant 0.000000e+00 : f32
    %21 = vector.shape_cast %16 : vector<1x128xi1> to vector<1x128xi1>
    %22 = vector.broadcast %21 : vector<1x128xi1> to vector<64x128xi1>
    %23 = vector.broadcast %cst_16 : f32 to vector<64x128xf32>
    %24 = arith.select %22, %23, %20 : vector<64x128xi1>, vector<64x128xf32>
    %c0_17 = arith.constant 0 : index
    %25 = memref.load %arg1[%c0_17] : memref<54xf32, #tpu.memory_space<smem>>
    %c9 = arith.constant 9 : index
    %26 = memref.load %arg1[%c9] : memref<54xf32, #tpu.memory_space<smem>>
    %27 = vector.broadcast %25 : f32 to vector<1x128xf32>
    %28 = vector.broadcast %26 : f32 to vector<1x128xf32>
    %29 = arith.select %14, %27, %28 : vector<1x128xi1>, vector<1x128xf32>
    %30 = vector.broadcast %29 : vector<1x128xf32> to vector<64x128xf32>
    %31 = arith.mulf %24, %30 : vector<64x128xf32>
    %c18 = arith.constant 18 : index
    %32 = memref.load %arg1[%c18] : memref<54xf32, #tpu.memory_space<smem>>
    %c27 = arith.constant 27 : index
    %33 = memref.load %arg1[%c27] : memref<54xf32, #tpu.memory_space<smem>>
    %34 = vector.broadcast %32 : f32 to vector<1x128xf32>
    %35 = vector.broadcast %33 : f32 to vector<1x128xf32>
    %36 = arith.select %14, %34, %35 : vector<1x128xi1>, vector<1x128xf32>
    %37 = vector.broadcast %36 : vector<1x128xf32> to vector<64x128xf32>
    %38 = arith.mulf %24, %37 : vector<64x128xf32>
    %c36 = arith.constant 36 : index
    %39 = memref.load %arg1[%c36] : memref<54xf32, #tpu.memory_space<smem>>
    %c45 = arith.constant 45 : index
    %40 = memref.load %arg1[%c45] : memref<54xf32, #tpu.memory_space<smem>>
    %41 = vector.broadcast %39 : f32 to vector<1x128xf32>
    %42 = vector.broadcast %40 : f32 to vector<1x128xf32>
    %43 = arith.select %14, %41, %42 : vector<1x128xi1>, vector<1x128xf32>
    %44 = vector.broadcast %43 : vector<1x128xf32> to vector<64x128xf32>
    %45 = arith.mulf %24, %44 : vector<64x128xf32>
    %c1_18 = arith.constant 1 : index
    %46 = memref.load %arg1[%c1_18] : memref<54xf32, #tpu.memory_space<smem>>
    %c10 = arith.constant 10 : index
    %47 = memref.load %arg1[%c10] : memref<54xf32, #tpu.memory_space<smem>>
    %48 = vector.broadcast %46 : f32 to vector<1x128xf32>
    %49 = vector.broadcast %47 : f32 to vector<1x128xf32>
    %50 = arith.select %14, %48, %49 : vector<1x128xi1>, vector<1x128xf32>
    %51 = vector.broadcast %50 : vector<1x128xf32> to vector<64x128xf32>
    %52 = arith.mulf %19, %51 : vector<64x128xf32>
    %53 = arith.addf %31, %52 : vector<64x128xf32>
    %c19 = arith.constant 19 : index
    %54 = memref.load %arg1[%c19] : memref<54xf32, #tpu.memory_space<smem>>
    %c28 = arith.constant 28 : index
    %55 = memref.load %arg1[%c28] : memref<54xf32, #tpu.memory_space<smem>>
    %56 = vector.broadcast %54 : f32 to vector<1x128xf32>
    %57 = vector.broadcast %55 : f32 to vector<1x128xf32>
    %58 = arith.select %14, %56, %57 : vector<1x128xi1>, vector<1x128xf32>
    %59 = vector.broadcast %58 : vector<1x128xf32> to vector<64x128xf32>
    %60 = arith.mulf %19, %59 : vector<64x128xf32>
    %61 = arith.addf %38, %60 : vector<64x128xf32>
    %c37 = arith.constant 37 : index
    %62 = memref.load %arg1[%c37] : memref<54xf32, #tpu.memory_space<smem>>
    %c46 = arith.constant 46 : index
    %63 = memref.load %arg1[%c46] : memref<54xf32, #tpu.memory_space<smem>>
    %64 = vector.broadcast %62 : f32 to vector<1x128xf32>
    %65 = vector.broadcast %63 : f32 to vector<1x128xf32>
    %66 = arith.select %14, %64, %65 : vector<1x128xi1>, vector<1x128xf32>
    %67 = vector.broadcast %66 : vector<1x128xf32> to vector<64x128xf32>
    %68 = arith.mulf %19, %67 : vector<64x128xf32>
    %69 = arith.addf %45, %68 : vector<64x128xf32>
    %c127_i32 = arith.constant 127 : i32
    %70 = tpu.dynamic_rotate %19 by %c127_i32 dim 1 : vector<64x128xf32>, i32 -> vector<64x128xf32>
    %cst_19 = arith.constant 0.000000e+00 : f32
    %71 = vector.shape_cast %18 : vector<1x128xi1> to vector<1x128xi1>
    %72 = vector.broadcast %71 : vector<1x128xi1> to vector<64x128xi1>
    %73 = vector.broadcast %cst_19 : f32 to vector<64x128xf32>
    %74 = arith.select %72, %73, %70 : vector<64x128xi1>, vector<64x128xf32>
    %c2 = arith.constant 2 : index
    %75 = memref.load %arg1[%c2] : memref<54xf32, #tpu.memory_space<smem>>
    %c11 = arith.constant 11 : index
    %76 = memref.load %arg1[%c11] : memref<54xf32, #tpu.memory_space<smem>>
    %77 = vector.broadcast %75 : f32 to vector<1x128xf32>
    %78 = vector.broadcast %76 : f32 to vector<1x128xf32>
    %79 = arith.select %14, %77, %78 : vector<1x128xi1>, vector<1x128xf32>
    %80 = vector.broadcast %79 : vector<1x128xf32> to vector<64x128xf32>
    %81 = arith.mulf %74, %80 : vector<64x128xf32>
    %82 = arith.addf %53, %81 : vector<64x128xf32>
    %c20 = arith.constant 20 : index
    %83 = memref.load %arg1[%c20] : memref<54xf32, #tpu.memory_space<smem>>
    %c29 = arith.constant 29 : index
    %84 = memref.load %arg1[%c29] : memref<54xf32, #tpu.memory_space<smem>>
    %85 = vector.broadcast %83 : f32 to vector<1x128xf32>
    %86 = vector.broadcast %84 : f32 to vector<1x128xf32>
    %87 = arith.select %14, %85, %86 : vector<1x128xi1>, vector<1x128xf32>
    %88 = vector.broadcast %87 : vector<1x128xf32> to vector<64x128xf32>
    %89 = arith.mulf %74, %88 : vector<64x128xf32>
    %90 = arith.addf %61, %89 : vector<64x128xf32>
    %c38 = arith.constant 38 : index
    %91 = memref.load %arg1[%c38] : memref<54xf32, #tpu.memory_space<smem>>
    %c47 = arith.constant 47 : index
    %92 = memref.load %arg1[%c47] : memref<54xf32, #tpu.memory_space<smem>>
    %93 = vector.broadcast %91 : f32 to vector<1x128xf32>
    %94 = vector.broadcast %92 : f32 to vector<1x128xf32>
    %95 = arith.select %14, %93, %94 : vector<1x128xi1>, vector<1x128xf32>
    %96 = vector.broadcast %95 : vector<1x128xf32> to vector<64x128xf32>
    %97 = arith.mulf %74, %96 : vector<64x128xf32>
    %98 = arith.addf %69, %97 : vector<64x128xf32>
    %c1_20 = arith.constant 1 : index
    %c0_21 = arith.constant 0 : index
    %99 = vector.load %arg4[%c1_20, %c0_21] : memref<72x128xf32, #tpu.memory_space<vmem>>, vector<64x128xf32>
    %c1_i32_22 = arith.constant 1 : i32
    %100 = tpu.dynamic_rotate %99 by %c1_i32_22 dim 1 : vector<64x128xf32>, i32 -> vector<64x128xf32>
    %cst_23 = arith.constant 0.000000e+00 : f32
    %101 = vector.shape_cast %16 : vector<1x128xi1> to vector<1x128xi1>
    %102 = vector.broadcast %101 : vector<1x128xi1> to vector<64x128xi1>
    %103 = vector.broadcast %cst_23 : f32 to vector<64x128xf32>
    %104 = arith.select %102, %103, %100 : vector<64x128xi1>, vector<64x128xf32>
    %c3 = arith.constant 3 : index
    %105 = memref.load %arg1[%c3] : memref<54xf32, #tpu.memory_space<smem>>
    %c12 = arith.constant 12 : index
    %106 = memref.load %arg1[%c12] : memref<54xf32, #tpu.memory_space<smem>>
    %107 = vector.broadcast %105 : f32 to vector<1x128xf32>
    %108 = vector.broadcast %106 : f32 to vector<1x128xf32>
    %109 = arith.select %14, %107, %108 : vector<1x128xi1>, vector<1x128xf32>
    %110 = vector.broadcast %109 : vector<1x128xf32> to vector<64x128xf32>
    %111 = arith.mulf %104, %110 : vector<64x128xf32>
    %112 = arith.addf %82, %111 : vector<64x128xf32>
    %c21 = arith.constant 21 : index
    %113 = memref.load %arg1[%c21] : memref<54xf32, #tpu.memory_space<smem>>
    %c30 = arith.constant 30 : index
    %114 = memref.load %arg1[%c30] : memref<54xf32, #tpu.memory_space<smem>>
    %115 = vector.broadcast %113 : f32 to vector<1x128xf32>
    %116 = vector.broadcast %114 : f32 to vector<1x128xf32>
    %117 = arith.select %14, %115, %116 : vector<1x128xi1>, vector<1x128xf32>
    %118 = vector.broadcast %117 : vector<1x128xf32> to vector<64x128xf32>
    %119 = arith.mulf %104, %118 : vector<64x128xf32>
    %120 = arith.addf %90, %119 : vector<64x128xf32>
    %c39 = arith.constant 39 : index
    %121 = memref.load %arg1[%c39] : memref<54xf32, #tpu.memory_space<smem>>
    %c48 = arith.constant 48 : index
    %122 = memref.load %arg1[%c48] : memref<54xf32, #tpu.memory_space<smem>>
    %123 = vector.broadcast %121 : f32 to vector<1x128xf32>
    %124 = vector.broadcast %122 : f32 to vector<1x128xf32>
    %125 = arith.select %14, %123, %124 : vector<1x128xi1>, vector<1x128xf32>
    %126 = vector.broadcast %125 : vector<1x128xf32> to vector<64x128xf32>
    %127 = arith.mulf %104, %126 : vector<64x128xf32>
    %128 = arith.addf %98, %127 : vector<64x128xf32>
    %c4 = arith.constant 4 : index
    %129 = memref.load %arg1[%c4] : memref<54xf32, #tpu.memory_space<smem>>
    %c13 = arith.constant 13 : index
    %130 = memref.load %arg1[%c13] : memref<54xf32, #tpu.memory_space<smem>>
    %131 = vector.broadcast %129 : f32 to vector<1x128xf32>
    %132 = vector.broadcast %130 : f32 to vector<1x128xf32>
    %133 = arith.select %14, %131, %132 : vector<1x128xi1>, vector<1x128xf32>
    %134 = vector.broadcast %133 : vector<1x128xf32> to vector<64x128xf32>
    %135 = arith.mulf %99, %134 : vector<64x128xf32>
    %136 = arith.addf %112, %135 : vector<64x128xf32>
    %c22 = arith.constant 22 : index
    %137 = memref.load %arg1[%c22] : memref<54xf32, #tpu.memory_space<smem>>
    %c31 = arith.constant 31 : index
    %138 = memref.load %arg1[%c31] : memref<54xf32, #tpu.memory_space<smem>>
    %139 = vector.broadcast %137 : f32 to vector<1x128xf32>
    %140 = vector.broadcast %138 : f32 to vector<1x128xf32>
    %141 = arith.select %14, %139, %140 : vector<1x128xi1>, vector<1x128xf32>
    %142 = vector.broadcast %141 : vector<1x128xf32> to vector<64x128xf32>
    %143 = arith.mulf %99, %142 : vector<64x128xf32>
    %144 = arith.addf %120, %143 : vector<64x128xf32>
    %c40 = arith.constant 40 : index
    %145 = memref.load %arg1[%c40] : memref<54xf32, #tpu.memory_space<smem>>
    %c49 = arith.constant 49 : index
    %146 = memref.load %arg1[%c49] : memref<54xf32, #tpu.memory_space<smem>>
    %147 = vector.broadcast %145 : f32 to vector<1x128xf32>
    %148 = vector.broadcast %146 : f32 to vector<1x128xf32>
    %149 = arith.select %14, %147, %148 : vector<1x128xi1>, vector<1x128xf32>
    %150 = vector.broadcast %149 : vector<1x128xf32> to vector<64x128xf32>
    %151 = arith.mulf %99, %150 : vector<64x128xf32>
    %152 = arith.addf %128, %151 : vector<64x128xf32>
    %c127_i32_24 = arith.constant 127 : i32
    %153 = tpu.dynamic_rotate %99 by %c127_i32_24 dim 1 : vector<64x128xf32>, i32 -> vector<64x128xf32>
    %cst_25 = arith.constant 0.000000e+00 : f32
    %154 = vector.shape_cast %18 : vector<1x128xi1> to vector<1x128xi1>
    %155 = vector.broadcast %154 : vector<1x128xi1> to vector<64x128xi1>
    %156 = vector.broadcast %cst_25 : f32 to vector<64x128xf32>
    %157 = arith.select %155, %156, %153 : vector<64x128xi1>, vector<64x128xf32>
    %c5 = arith.constant 5 : index
    %158 = memref.load %arg1[%c5] : memref<54xf32, #tpu.memory_space<smem>>
    %c14 = arith.constant 14 : index
    %159 = memref.load %arg1[%c14] : memref<54xf32, #tpu.memory_space<smem>>
    %160 = vector.broadcast %158 : f32 to vector<1x128xf32>
    %161 = vector.broadcast %159 : f32 to vector<1x128xf32>
    %162 = arith.select %14, %160, %161 : vector<1x128xi1>, vector<1x128xf32>
    %163 = vector.broadcast %162 : vector<1x128xf32> to vector<64x128xf32>
    %164 = arith.mulf %157, %163 : vector<64x128xf32>
    %165 = arith.addf %136, %164 : vector<64x128xf32>
    %c23 = arith.constant 23 : index
    %166 = memref.load %arg1[%c23] : memref<54xf32, #tpu.memory_space<smem>>
    %c32 = arith.constant 32 : index
    %167 = memref.load %arg1[%c32] : memref<54xf32, #tpu.memory_space<smem>>
    %168 = vector.broadcast %166 : f32 to vector<1x128xf32>
    %169 = vector.broadcast %167 : f32 to vector<1x128xf32>
    %170 = arith.select %14, %168, %169 : vector<1x128xi1>, vector<1x128xf32>
    %171 = vector.broadcast %170 : vector<1x128xf32> to vector<64x128xf32>
    %172 = arith.mulf %157, %171 : vector<64x128xf32>
    %173 = arith.addf %144, %172 : vector<64x128xf32>
    %c41 = arith.constant 41 : index
    %174 = memref.load %arg1[%c41] : memref<54xf32, #tpu.memory_space<smem>>
    %c50 = arith.constant 50 : index
    %175 = memref.load %arg1[%c50] : memref<54xf32, #tpu.memory_space<smem>>
    %176 = vector.broadcast %174 : f32 to vector<1x128xf32>
    %177 = vector.broadcast %175 : f32 to vector<1x128xf32>
    %178 = arith.select %14, %176, %177 : vector<1x128xi1>, vector<1x128xf32>
    %179 = vector.broadcast %178 : vector<1x128xf32> to vector<64x128xf32>
    %180 = arith.mulf %157, %179 : vector<64x128xf32>
    %181 = arith.addf %152, %180 : vector<64x128xf32>
    %c2_26 = arith.constant 2 : index
    %c0_27 = arith.constant 0 : index
    %182 = vector.load %arg4[%c2_26, %c0_27] : memref<72x128xf32, #tpu.memory_space<vmem>>, vector<64x128xf32>
    %c1_i32_28 = arith.constant 1 : i32
    %183 = tpu.dynamic_rotate %182 by %c1_i32_28 dim 1 : vector<64x128xf32>, i32 -> vector<64x128xf32>
    %cst_29 = arith.constant 0.000000e+00 : f32
    %184 = vector.shape_cast %16 : vector<1x128xi1> to vector<1x128xi1>
    %185 = vector.broadcast %184 : vector<1x128xi1> to vector<64x128xi1>
    %186 = vector.broadcast %cst_29 : f32 to vector<64x128xf32>
    %187 = arith.select %185, %186, %183 : vector<64x128xi1>, vector<64x128xf32>
    %c6 = arith.constant 6 : index
    %188 = memref.load %arg1[%c6] : memref<54xf32, #tpu.memory_space<smem>>
    %c15 = arith.constant 15 : index
    %189 = memref.load %arg1[%c15] : memref<54xf32, #tpu.memory_space<smem>>
    %190 = vector.broadcast %188 : f32 to vector<1x128xf32>
    %191 = vector.broadcast %189 : f32 to vector<1x128xf32>
    %192 = arith.select %14, %190, %191 : vector<1x128xi1>, vector<1x128xf32>
    %193 = vector.broadcast %192 : vector<1x128xf32> to vector<64x128xf32>
    %194 = arith.mulf %187, %193 : vector<64x128xf32>
    %195 = arith.addf %165, %194 : vector<64x128xf32>
    %c24 = arith.constant 24 : index
    %196 = memref.load %arg1[%c24] : memref<54xf32, #tpu.memory_space<smem>>
    %c33 = arith.constant 33 : index
    %197 = memref.load %arg1[%c33] : memref<54xf32, #tpu.memory_space<smem>>
    %198 = vector.broadcast %196 : f32 to vector<1x128xf32>
    %199 = vector.broadcast %197 : f32 to vector<1x128xf32>
    %200 = arith.select %14, %198, %199 : vector<1x128xi1>, vector<1x128xf32>
    %201 = vector.broadcast %200 : vector<1x128xf32> to vector<64x128xf32>
    %202 = arith.mulf %187, %201 : vector<64x128xf32>
    %203 = arith.addf %173, %202 : vector<64x128xf32>
    %c42 = arith.constant 42 : index
    %204 = memref.load %arg1[%c42] : memref<54xf32, #tpu.memory_space<smem>>
    %c51 = arith.constant 51 : index
    %205 = memref.load %arg1[%c51] : memref<54xf32, #tpu.memory_space<smem>>
    %206 = vector.broadcast %204 : f32 to vector<1x128xf32>
    %207 = vector.broadcast %205 : f32 to vector<1x128xf32>
    %208 = arith.select %14, %206, %207 : vector<1x128xi1>, vector<1x128xf32>
    %209 = vector.broadcast %208 : vector<1x128xf32> to vector<64x128xf32>
    %210 = arith.mulf %187, %209 : vector<64x128xf32>
    %211 = arith.addf %181, %210 : vector<64x128xf32>
    %c7 = arith.constant 7 : index
    %212 = memref.load %arg1[%c7] : memref<54xf32, #tpu.memory_space<smem>>
    %c16 = arith.constant 16 : index
    %213 = memref.load %arg1[%c16] : memref<54xf32, #tpu.memory_space<smem>>
    %214 = vector.broadcast %212 : f32 to vector<1x128xf32>
    %215 = vector.broadcast %213 : f32 to vector<1x128xf32>
    %216 = arith.select %14, %214, %215 : vector<1x128xi1>, vector<1x128xf32>
    %217 = vector.broadcast %216 : vector<1x128xf32> to vector<64x128xf32>
    %218 = arith.mulf %182, %217 : vector<64x128xf32>
    %219 = arith.addf %195, %218 : vector<64x128xf32>
    %c25 = arith.constant 25 : index
    %220 = memref.load %arg1[%c25] : memref<54xf32, #tpu.memory_space<smem>>
    %c34 = arith.constant 34 : index
    %221 = memref.load %arg1[%c34] : memref<54xf32, #tpu.memory_space<smem>>
    %222 = vector.broadcast %220 : f32 to vector<1x128xf32>
    %223 = vector.broadcast %221 : f32 to vector<1x128xf32>
    %224 = arith.select %14, %222, %223 : vector<1x128xi1>, vector<1x128xf32>
    %225 = vector.broadcast %224 : vector<1x128xf32> to vector<64x128xf32>
    %226 = arith.mulf %182, %225 : vector<64x128xf32>
    %227 = arith.addf %203, %226 : vector<64x128xf32>
    %c43 = arith.constant 43 : index
    %228 = memref.load %arg1[%c43] : memref<54xf32, #tpu.memory_space<smem>>
    %c52 = arith.constant 52 : index
    %229 = memref.load %arg1[%c52] : memref<54xf32, #tpu.memory_space<smem>>
    %230 = vector.broadcast %228 : f32 to vector<1x128xf32>
    %231 = vector.broadcast %229 : f32 to vector<1x128xf32>
    %232 = arith.select %14, %230, %231 : vector<1x128xi1>, vector<1x128xf32>
    %233 = vector.broadcast %232 : vector<1x128xf32> to vector<64x128xf32>
    %234 = arith.mulf %182, %233 : vector<64x128xf32>
    %235 = arith.addf %211, %234 : vector<64x128xf32>
    %c127_i32_30 = arith.constant 127 : i32
    %236 = tpu.dynamic_rotate %182 by %c127_i32_30 dim 1 : vector<64x128xf32>, i32 -> vector<64x128xf32>
    %cst_31 = arith.constant 0.000000e+00 : f32
    %237 = vector.shape_cast %18 : vector<1x128xi1> to vector<1x128xi1>
    %238 = vector.broadcast %237 : vector<1x128xi1> to vector<64x128xi1>
    %239 = vector.broadcast %cst_31 : f32 to vector<64x128xf32>
    %240 = arith.select %238, %239, %236 : vector<64x128xi1>, vector<64x128xf32>
    %c8 = arith.constant 8 : index
    %241 = memref.load %arg1[%c8] : memref<54xf32, #tpu.memory_space<smem>>
    %c17 = arith.constant 17 : index
    %242 = memref.load %arg1[%c17] : memref<54xf32, #tpu.memory_space<smem>>
    %243 = vector.broadcast %241 : f32 to vector<1x128xf32>
    %244 = vector.broadcast %242 : f32 to vector<1x128xf32>
    %245 = arith.select %14, %243, %244 : vector<1x128xi1>, vector<1x128xf32>
    %246 = vector.broadcast %245 : vector<1x128xf32> to vector<64x128xf32>
    %247 = arith.mulf %240, %246 : vector<64x128xf32>
    %248 = arith.addf %219, %247 : vector<64x128xf32>
    %c26 = arith.constant 26 : index
    %249 = memref.load %arg1[%c26] : memref<54xf32, #tpu.memory_space<smem>>
    %c35 = arith.constant 35 : index
    %250 = memref.load %arg1[%c35] : memref<54xf32, #tpu.memory_space<smem>>
    %251 = vector.broadcast %249 : f32 to vector<1x128xf32>
    %252 = vector.broadcast %250 : f32 to vector<1x128xf32>
    %253 = arith.select %14, %251, %252 : vector<1x128xi1>, vector<1x128xf32>
    %254 = vector.broadcast %253 : vector<1x128xf32> to vector<64x128xf32>
    %255 = arith.mulf %240, %254 : vector<64x128xf32>
    %256 = arith.addf %227, %255 : vector<64x128xf32>
    %c44 = arith.constant 44 : index
    %257 = memref.load %arg1[%c44] : memref<54xf32, #tpu.memory_space<smem>>
    %c53 = arith.constant 53 : index
    %258 = memref.load %arg1[%c53] : memref<54xf32, #tpu.memory_space<smem>>
    %259 = vector.broadcast %257 : f32 to vector<1x128xf32>
    %260 = vector.broadcast %258 : f32 to vector<1x128xf32>
    %261 = arith.select %14, %259, %260 : vector<1x128xi1>, vector<1x128xf32>
    %262 = vector.broadcast %261 : vector<1x128xf32> to vector<64x128xf32>
    %263 = arith.mulf %240, %262 : vector<64x128xf32>
    %264 = arith.addf %235, %263 : vector<64x128xf32>
    %c64_i32_32 = arith.constant 64 : i32
    %265 = tpu.dynamic_rotate %248 by %c64_i32_32 dim 1 : vector<64x128xf32>, i32 -> vector<64x128xf32>
    %266 = arith.addf %248, %265 : vector<64x128xf32>
    %c0_33 = arith.constant 0 : index
    %267 = memref.load %arg2[%c0_33] : memref<3xf32, #tpu.memory_space<smem>>
    %268 = vector.broadcast %267 : f32 to vector<64x128xf32>
    %269 = arith.addf %266, %268 : vector<64x128xf32>
    %c0_34 = arith.constant 0 : index
    %c0_35 = arith.constant 0 : index
    %c0_36 = arith.constant 0 : index
    %270 = vector.load %arg3[%c0_34, %c0_35, %c0_36] : memref<3x64x128xf32, #tpu.memory_space<vmem>>, vector<1x64x128xf32>
    %271 = vector.shape_cast %270 : vector<1x64x128xf32> to vector<64x128xf32>
    %272 = vector.shape_cast %269 : vector<64x128xf32> to vector<1x64x128xf32>
    tpu.vector_store %arg3[%c0_34, %c0_35, %c0_36], %272 {strides = array<i32>} : memref<3x64x128xf32, #tpu.memory_space<vmem>>, vector<1x64x128xf32>,
    %c64_i32_37 = arith.constant 64 : i32
    %273 = tpu.dynamic_rotate %256 by %c64_i32_37 dim 1 : vector<64x128xf32>, i32 -> vector<64x128xf32>
    %274 = arith.addf %256, %273 : vector<64x128xf32>
    %c1_38 = arith.constant 1 : index
    %275 = memref.load %arg2[%c1_38] : memref<3xf32, #tpu.memory_space<smem>>
    %276 = vector.broadcast %275 : f32 to vector<64x128xf32>
    %277 = arith.addf %274, %276 : vector<64x128xf32>
    %c1_39 = arith.constant 1 : index
    %c0_40 = arith.constant 0 : index
    %c0_41 = arith.constant 0 : index
    %278 = vector.load %arg3[%c1_39, %c0_40, %c0_41] : memref<3x64x128xf32, #tpu.memory_space<vmem>>, vector<1x64x128xf32>
    %279 = vector.shape_cast %278 : vector<1x64x128xf32> to vector<64x128xf32>
    %280 = vector.shape_cast %277 : vector<64x128xf32> to vector<1x64x128xf32>
    tpu.vector_store %arg3[%c1_39, %c0_40, %c0_41], %280 {strides = array<i32>} : memref<3x64x128xf32, #tpu.memory_space<vmem>>, vector<1x64x128xf32>,
    %c64_i32_42 = arith.constant 64 : i32
    %281 = tpu.dynamic_rotate %264 by %c64_i32_42 dim 1 : vector<64x128xf32>, i32 -> vector<64x128xf32>
    %282 = arith.addf %264, %281 : vector<64x128xf32>
    %c2_43 = arith.constant 2 : index
    %283 = memref.load %arg2[%c2_43] : memref<3xf32, #tpu.memory_space<smem>>
    %284 = vector.broadcast %283 : f32 to vector<64x128xf32>
    %285 = arith.addf %282, %284 : vector<64x128xf32>
    %c2_44 = arith.constant 2 : index
    %c0_45 = arith.constant 0 : index
    %c0_46 = arith.constant 0 : index
    %286 = vector.load %arg3[%c2_44, %c0_45, %c0_46] : memref<3x64x128xf32, #tpu.memory_space<vmem>>, vector<1x64x128xf32>
    %287 = vector.shape_cast %286 : vector<1x64x128xf32> to vector<64x128xf32>
    %288 = vector.shape_cast %285 : vector<64x128xf32> to vector<1x64x128xf32>
    tpu.vector_store %arg3[%c2_44, %c0_45, %c0_46], %288 {strides = array<i32>} : memref<3x64x128xf32, #tpu.memory_space<vmem>>, vector<1x64x128xf32>,
    return
  }
}

</mosaic_0001>

<bundles_post_ra>
// kernel: conv_sub.1
= control target key start
LH: loop header
LB: loop body
LE: loop exit
PB: predicated region body
PF: predicated region fallthrough
CT: control target
= control target key end

     0   :  { %8 = vsyncpa [#allocation4], 0  ;;  %s2577_s0 = inlined_call_operand.hbm [shape: f32[1,2,64,64], index: 0, kind: input, shape index: {}]   ;;  %s2578_s1 = inlined_call_operand.vmem [shape: f32[54], index: 1, kind: input, shape index: {}]   ;;  %s2579_s2 = inlined_call_operand.vmem [shape: f32[3], index: 2, kind: input, shape index: {}]   ;;  %s2580_s3 = inlined_call_operand.vmem [shape: f32[3,64,128], index: 3, kind: output, shape index: {}]  }
   0x1   :  { %9 = vsyncpa [#allocation5], 0 }
   0x2   :  { %10 = vsyncpa [#allocation8], 0  ;;  %s1116_s12 = smov [#allocation3]   ;;  %s29_s16 = sshll.u32 %s2578_s1, 4  ;;  %s30_s16 = int_to_ptr.vmem [resolvable:$true] %s29_s16 }
   0x3   :  { %s16_s13 = sshll.u32 %s1116_s12, 4  ;;  %s17_s13 = int_to_ptr.vmem [resolvable:$true] %s16_s13 }
   0x4   :  { %s1074_s17 = scalar_lea.vmem %s17_s13, 2048  ;;  %p1079_p1 = scmp.lt.s32.totalorder %s17_s13, %s17_s13 }
   0x5   :  { %p1075_p0 = scmp.ne.s32.totalorder %s17_s13, %s1074_s17  ;;  %p1080_p2 = scmp.lt.s32.totalorder %s1074_s17, %s1074_s17 }
   0x7   :  { %p1081_p3 = por %p1080_p2, %p1079_p1 }
   0x9   :  { %p1082_p4 = pnand %p1081_p3, %p1075_p0 }
   0xb   :  { %1085 = shalt.err (!%p1082_p4)
}
   0xc   :  { %s1117_s18 = smov 128   ;;  %s1118_s19 = smov 8  }
   0xd   :  { %22 = dma.hbm_to_vmem [thread:$0]  %s2577_s0, 2048, %s17_s13, [#allocation4], %s1117_s18, %s1117_s18, %s1118_s19  }
   0xe   :  { %s1086_s22 = scalar_lea.vmem %s30_s16, 16  ;;  %p1091_p6 = scmp.lt.s32.totalorder %s30_s16, %s30_s16 }
   0xf   :  { %p1087_p5 = scmp.ne.s32.totalorder %s30_s16, %s1086_s22  ;;  %p1092_p7 = scmp.lt.s32.totalorder %s1086_s22, %s1086_s22 }
  0x11   :  { %p1093_p8 = por %p1092_p7, %p1091_p6 }
  0x13   :  { %p1094_p9 = pnand %p1093_p8, %p1087_p5 }
  0x15   :  { %1097 = shalt.err (!%p1094_p9)
}
  0x16   :  { %s1119_s1 = smov [#allocation6]   ;;  %s39_s25 = sshll.u32 %s2579_s2, 4  ;;  %s40_s25 = int_to_ptr.vmem [resolvable:$true] %s39_s25 }
  0x17   :  { %32 = dma.vmem_to_smem %s30_s16, 16, %s1119_s1, [#allocation5]  }
  0x18   :  { %s1098_s26 = scalar_lea.vmem %s40_s25, 16  ;;  %p1103_p11 = scmp.lt.s32.totalorder %s40_s25, %s40_s25 }
  0x19   :  { %p1099_p10 = scmp.ne.s32.totalorder %s40_s25, %s1098_s26  ;;  %p1104_p12 = scmp.lt.s32.totalorder %s1098_s26, %s1098_s26 }
  0x1b   :  { %p1105_p13 = por %p1104_p12, %p1103_p11 }
  0x1d   :  { %p1106_p0 = pnand %p1105_p13, %p1099_p10 }
  0x1f   :  { %1109 = shalt.err (!%p1106_p0)
}
  0x20   :  { %s1120_s0 = smov [#allocation7]  }
  0x21   :  { %42 = dma.vmem_to_smem %s40_s25, 16, %s1120_s0, [#allocation8]  }
  0x22   :  { %1110 = dma.done.wait [#allocation4], 2048  }
  0x23   :  { %1111 = vsyncadd [#allocation4], 4294965248 }
  0x24   :  { %1112 = dma.done.wait [#allocation5], 16  }
  0x25   :  { %1113 = vsyncadd [#allocation5], 4294967280 }
  0x26   :  { %1114 = dma.done.wait [#allocation8], 16  }
  0x27   :  { %1115 = vsyncadd [#allocation8], 4294967280 }
  0x28   :  { %52 = sfence }
  0x29   :  { %v75_v0 = vld [vmem:[#allocation3 + $0x50] sm:$0xff]  ;;  %v73_v1 = vld [vmem:[#allocation3 + $0x40] sm:$0xff]  ;;  %s1121_s2 = smov 64   ;;  %vm63_vm0 = vcmask 523264   ;;  %v76_v2 = vld [vmem:[#allocation3 + $0x58] sm:$0xff]  ;;  %v1122_v5 = vmov 0.0   ;;  %v122_v49 = vlaneseq }
  0x2a   :  { %93 = vrot.lane.b32.xlu1 %v75_v0, %s1121_s2  ;;  %89 = vrot.lane.b32.xlu0 %v73_v1, %s1121_s2  ;;  %v74_v3 = vld [vmem:[#allocation3 + $0x48] sm:$0xff]  ;;  %v57_v4 = vld [vmem:[#allocation3 + $0x10] sm:$0xff]  ;;  %53 = vst [vmem:[#allocation2] sm:$0x1] %v1122_v5  ;;  %54 = vst [vmem:[#allocation2 + $0x41] sm:$0x1] %v1122_v5 }
  0x2b   :  { %66 = vst.msk [vmem:[#allocation2 + $0x11] sm:$0xff] %vm63_vm0, %v57_v4  ;;  %v55_v6 = vld [vmem:[#allocation3] sm:$0xff]  ;;  %v58_v7 = vld [vmem:[#allocation3 + $0x18] sm:$0xff]  ;;  %v56_v8 = vld [vmem:[#allocation3 + $0x8] sm:$0xff]  ;;  %vm113_vm1 = vcmask 1048064   ;;  %s1123_s27 = smov 1  }
  0x2c   :  { %64 = vst.msk [vmem:[#allocation2 + $0x1] sm:$0xff] %vm63_vm0, %v55_v6  ;;  %67 = vst.msk [vmem:[#allocation2 + $0x19] sm:$0xff] %vm63_vm0, %v58_v7  ;;  %v59_v9 = vld [vmem:[#allocation3 + $0x20] sm:$0xff]  ;;  %v60_v10 = vld [vmem:[#allocation3 + $0x28] sm:$0xff]  ;;  %s1124_s28 = smov 127   ;;  %s1308_s29 = sld [smem:[#allocation6 + $0x1]] }
  0x2d   :  { %65 = vst.msk [vmem:[#allocation2 + $0x9] sm:$0xff] %vm63_vm0, %v56_v8  ;;  %v61_v11 = vld [vmem:[#allocation3 + $0x30] sm:$0xff]  ;;  %68 = vst.msk [vmem:[#allocation2 + $0x21] sm:$0xff] %vm63_vm0, %v59_v9  ;;  %v62_v12 = vld [vmem:[#allocation3 + $0x38] sm:$0xff]  ;;  %s984_s30 = sld [smem:[#allocation6 + $0xa]]  ;;  %v1352_v50 = vand.u32 127, %v122_v49 }
  0x2e   :  { %95 = vrot.lane.b32.xlu1 %v76_v2, %s1121_s2  ;;  %91 = vrot.lane.b32.xlu0 %v74_v3, %s1121_s2  ;;  %69 = vst.msk [vmem:[#allocation2 + $0x29] sm:$0xff] %vm63_vm0, %v60_v10  ;;  %70 = vst.msk [vmem:[#allocation2 + $0x31] sm:$0xff] %vm63_vm0, %v61_v11  ;;  %v77_v13 = vld [vmem:[#allocation3 + $0x60] sm:$0xff]  ;;  %v78_v14 = vld [vmem:[#allocation3 + $0x68] sm:$0xff]  ;;  %s1314_s4 = sld [smem:[#allocation6 + $0x13]] }
  0x2f   :  { %71 = vst.msk [vmem:[#allocation2 + $0x39] sm:$0xff] %vm63_vm0, %v62_v12  ;;  %v79_v15 = vld [vmem:[#allocation3 + $0x70] sm:$0xff]  ;;  %v80_v16 = vld [vmem:[#allocation3 + $0x78] sm:$0xff]  ;;  %s1316_s5 = sld [smem:[#allocation6 + $0x1c]]  ;;  %vm125_vm2 = vcmp.lt.s32.totalorder %v1352_v50, 64  ;;  %v2581_v61 = vand.u32 63, %v1352_v50 }
  0x30   :  { %s1318_s6 = sld [smem:[#allocation6 + $0x25]] }
  0x31   :  { %s1324_s7 = sld [smem:[#allocation6 + $0x2e]]  ;;  %vm1407_vm3 = vcmp.eq.s32.totalorder %v2581_v61, 0 }
  0x32   :  { %97 = vrot.lane.b32.xlu0 %v77_v13, %s1121_s2  ;;  %99 = vrot.lane.b32.xlu1 %v78_v14, %s1121_s2  ;;  %s1326_s8 = sld [smem:[#allocation6 + $0x4]]  ;;  %v203_v51 = vstv %s1308_s29 }
  0x33   :  { %s1328_s9 = sld [smem:[#allocation6 + $0xd]]  ;;  %v204_v52 = vstv %s984_s30 }
  0x34   :  { %s1330_s10 = sld [smem:[#allocation6 + $0x16]]  ;;  %v1368_v53 = vsel %vm125_vm2, %v203_v51, %v204_v52  ;;  %v224_v54 = vstv %s1314_s4 }
  0x35   :  { %s1336_s11 = sld [smem:[#allocation6 + $0x1f]]  ;;  %v225_v55 = vstv %s1316_s5 }
  0x36   :  { %101 = vrot.lane.b32.xlu0 %v79_v15, %s1121_s2  ;;  %103 = vrot.lane.b32.xlu1 %v80_v16, %s1121_s2  ;;  %s1338_s12 = sld [smem:[#allocation6 + $0x28]]  ;;  %v245_v56 = vstv %s1318_s6  ;;  %v1391_v9 = vsel %vm125_vm2, %v224_v54, %v225_v55 }
  0x37   :  { %s1340_s13 = sld [smem:[#allocation6 + $0x31]]  ;;  %v246_v57 = vstv %s1324_s7 }
  0x38   :  { %s1342_s14 = sld [smem:[#allocation6 + $0x7]]  ;;  %v450_v58 = vstv %s1326_s8  ;;  %v1395_v10 = vsel %vm125_vm2, %v245_v56, %v246_v57 }
  0x39   :  { %s1346_s15 = sld [smem:[#allocation6 + $0x10]]  ;;  %v451_v59 = vstv %s1328_s9 }
  0x3a   :  { %s1348_s16 = sld [smem:[#allocation6]]  ;;  %v471_v60 = vstv %s1330_s10  ;;  %v1399_v11 = vsel %vm125_vm2, %v450_v58, %v451_v59 }
  0x3b   :  { %s1350_s17 = sld [smem:[#allocation6 + $0x9]]  ;;  %v472_v62 = vstv %s1336_s11  ;;  %2624 = vst [vmem:[#allocation22_spill] sm:$0xff] %v1399_v11 }
  0x3c   :  { %s1354_s18 = sld [smem:[#allocation6 + $0x12]]  ;;  %v492_v63 = vstv %s1338_s12  ;;  %v1403_v12 = vsel %vm125_vm2, %v471_v60, %v472_v62 }
  0x3d   :  { %s1356_s19 = sld [smem:[#allocation6 + $0x1b]]  ;;  %v493_v0 = vstv %s1340_s13  ;;  %2625 = vst [vmem:[#allocation23_spill] sm:$0xff] %v1403_v12 }
  0x3e   :  { %s1358_s20 = sld [smem:[#allocation6 + $0x24]]  ;;  %v695_v3 = vstv %s1342_s14  ;;  %v1413_v14 = vsel %vm125_vm2, %v492_v63, %v493_v0 }
  0x3f   :  { %s1360_s21 = sld [smem:[#allocation6 + $0x2d]]  ;;  %v696_v4 = vstv %s1346_s15  ;;  %2628 = vst [vmem:[#allocation24_spill] sm:$0xff] %v1413_v14 }
  0x40   :  { %s1364_s22 = sld [smem:[#allocation6 + $0x19]]  ;;  %v164_v1 = vstv %s1348_s16  ;;  %v1417_v15 = vsel %vm125_vm2, %v695_v3, %v696_v4 }
  0x41   :  { %v165_v2 = vstv %s1350_s17  ;;  %2629 = vst [vmem:[#allocation25_spill] sm:$0xff] %v1417_v15  ;;  %s1489_s1 = sld [smem:[#allocation6 + $0x22]] }
  0x42   :  { %v177_v5 = vstv %s1354_s18  ;;  %s1499_s23 = sld [smem:[#allocation6 + $0x2b]] }
  0x43   :  { %v178_v6 = vstv %s1356_s19  ;;  %s1509_s24 = sld [smem:[#allocation6 + $0x2]] }
  0x44   :  { %v190_v7 = vstv %s1358_s20  ;;  %s1515_s25 = sld [smem:[#allocation6 + $0xb]] }
  0x45   :  { %v191_v8 = vstv %s1360_s21  ;;  %s1523_s26 = sld [smem:[#allocation6 + $0x14]] }
  0x46   :  { %s1533_s0 = sld [smem:[#allocation6 + $0x1d]] }
  0x47   :  { %s1565_s29 = sld [smem:[#allocation6 + $0x3]] }
  0x48   :  { %s1575_s30 = sld [smem:[#allocation6 + $0xc]] }
  0x49   :  { %s1582_s4 = sld [smem:[#allocation6 + $0x15]] }
  0x4a   :  { %s1585_s5 = sld [smem:[#allocation6 + $0x1e]] }
  0x4b   :  { %s1600_s6 = sld [smem:[#allocation6 + $0x27]] }
  0x4c   :  { %s1604_s7 = sld [smem:[#allocation6 + $0x30]] }
  0x4d   :  { %s1816_s8 = sld [smem:[#allocation6 + $0x34]] }
  0x4e   :  { %s1822_s9 = sld [smem:[#allocation6 + $0x5]] }
  0x4f   :  { %s1825_s10 = sld [smem:[#allocation6 + $0xe]] }
  0x50   :  { %s1837_s11 = sld [smem:[#allocation6 + $0x17]] }
  0x51   :  { %s1845_s12 = sld [smem:[#allocation6 + $0x20]] }
  0x52   :  { %s1852_s13 = sld [smem:[#allocation6 + $0x29]] }
  0x53   :  { %s1857_s14 = sld [smem:[#allocation6 + $0x32]] }
  0x54   :  { %s1871_s15 = sld [smem:[#allocation6 + $0x6]] }
  0x55   :  { %s1877_s16 = sld [smem:[#allocation6 + $0xf]] }
  0x56   :  { %s1889_s17 = sld [smem:[#allocation6 + $0x18]] }
  0x57   :  { %s1892_s18 = sld [smem:[#allocation6 + $0x21]] }
  0x58   :  { %s1906_s19 = sld [smem:[#allocation6 + $0x2a]] }
  0x59   :  { %s1914_s20 = sld [smem:[#allocation6 + $0x33]] }
  0x5a   :  { %s1921_s21 = sld [smem:[#allocation6 + $0x8]] }
  0x9c   :  { %v94_v17 = vpop.permute.xlu1 %93  ;;  %v90_v18 = vpop.permute.xlu0 %89 }
  0x9d   :  { %116 = vst.msk [vmem:[#allocation2 + $0x11] sm:$0xff] %vm113_vm1, %v94_v17  ;;  %114 = vst.msk [vmem:[#allocation2 + $0x1] sm:$0xff] %vm113_vm1, %v90_v18  ;;  %v1422_v17 = vsel %vm125_vm2, %v164_v1, %v165_v2  ;;  %v1426_v18 = vsel %vm125_vm2, %v177_v5, %v178_v6 }
  0xa0   :  { %v96_v19 = vpop.permute.xlu1 %95  ;;  %v92_v20 = vpop.permute.xlu0 %91 }
  0xa1   :  { %117 = vst.msk [vmem:[#allocation2 + $0x19] sm:$0xff] %vm113_vm1, %v96_v19  ;;  %115 = vst.msk [vmem:[#allocation2 + $0x9] sm:$0xff] %vm113_vm1, %v92_v20  ;;  %v1430_v19 = vsel %vm125_vm2, %v190_v7, %v191_v8 }
  0xa4   :  { %v98_v21 = vpop.permute.xlu0 %97  ;;  %v1174_v22 = vld [vmem:[#allocation2] sm:$0xff]  ;;  %v100_v23 = vpop.permute.xlu1 %99  ;;  %v1232_v35 = vld [vmem:[#allocation2 + $0x11] sm:$0xff] }
  0xa5   :  { %118 = vst.msk [vmem:[#allocation2 + $0x21] sm:$0xff] %vm113_vm1, %v98_v21  ;;  %136 = vrot.lane.b32.xlu0 %v1174_v22, %s1123_s27  ;;  %119 = vst.msk [vmem:[#allocation2 + $0x29] sm:$0xff] %vm113_vm1, %v100_v23  ;;  %v1224_v33 = vld [vmem:[#allocation2 + $0x1] sm:$0xff]  ;;  %v206_v20 = vmul.f32 %v1368_v53, %v1174_v22  ;;  %v227_v23 = vmul.f32 %v1391_v9, %v1174_v22 }
  0xa8   :  { %v102_v24 = vpop.permute.xlu0 %101  ;;  %v1180_v25 = vld [vmem:[#allocation2 + $0x8] sm:$0xff]  ;;  %v1182_v26 = vld [vmem:[#allocation2 + $0x10] sm:$0xff]  ;;  %v104_v27 = vpop.permute.xlu1 %103  ;;  %v1190_v28 = vld [vmem:[#allocation2 + $0x18] sm:$0xff] }
  0xa9   :  { %120 = vst.msk [vmem:[#allocation2 + $0x31] sm:$0xff] %vm113_vm1, %v102_v24  ;;  %138 = vrot.lane.b32.xlu1 %v1180_v25, %s1123_s27  ;;  %140 = vrot.lane.b32.xlu0 %v1182_v26, %s1123_s27  ;;  %121 = vst.msk [vmem:[#allocation2 + $0x39] sm:$0xff] %vm113_vm1, %v104_v27  ;;  %v1230_v34 = vld [vmem:[#allocation2 + $0x9] sm:$0xff]  ;;  %v1238_v36 = vld [vmem:[#allocation2 + $0x19] sm:$0xff]  ;;  %v248_v24 = vmul.f32 %v1395_v10, %v1174_v22  ;;  %v207_v27 = vmul.f32 %v1368_v53, %v1180_v25 }
  0xaa   :  { %v1272_v41 = vld [vmem:[#allocation2 + $0x2] sm:$0xff]  ;;  %v1278_v42 = vld [vmem:[#allocation2 + $0xa] sm:$0xff]  ;;  %v1280_v43 = vld [vmem:[#allocation2 + $0x12] sm:$0xff]  ;;  %v228_v49 = vmul.f32 %v1391_v9, %v1180_v25  ;;  %v249_v52 = vmul.f32 %v1395_v10, %v1180_v25  ;;  %v208_v54 = vmul.f32 %v1368_v53, %v1182_v26  ;;  %v229_v55 = vmul.f32 %v1391_v9, %v1182_v26 }
  0xab   :  { %2616 = vst [vmem:[#allocation14_spill] sm:$0xff] %v1272_v41  ;;  %2617 = vst [vmem:[#allocation15_spill] sm:$0xff] %v1278_v42  ;;  %v250_v58 = vmul.f32 %v1395_v10, %v1182_v26  ;;  %v209_v59 = vmul.f32 %v1368_v53, %v1190_v28  ;;  %v251_v60 = vmul.f32 %v1395_v10, %v1190_v28 }
  0xac   :  { %v1192_v29 = vld [vmem:[#allocation2 + $0x20] sm:$0xff]  ;;  %v1198_v30 = vld [vmem:[#allocation2 + $0x28] sm:$0xff]  ;;  %2618 = vst [vmem:[#allocation16_spill] sm:$0xff] %v1280_v43 }
  0xad   :  { %142 = vrot.lane.b32.xlu1 %v1190_v28, %s1123_s27  ;;  %144 = vrot.lane.b32.xlu0 %v1192_v29, %s1123_s27  ;;  %v1240_v37 = vld [vmem:[#allocation2 + $0x21] sm:$0xff]  ;;  %v1246_v38 = vld [vmem:[#allocation2 + $0x29] sm:$0xff]  ;;  %v210_v62 = vmul.f32 %v1368_v53, %v1192_v29  ;;  %v231_v3 = vmul.f32 %v1391_v9, %v1192_v29  ;;  %v252_v5 = vmul.f32 %v1395_v10, %v1192_v29 }
  0xae   :  { %v1286_v44 = vld [vmem:[#allocation2 + $0x1a] sm:$0xff]  ;;  %v1288_v45 = vld [vmem:[#allocation2 + $0x22] sm:$0xff]  ;;  %v211_v6 = vmul.f32 %v1368_v53, %v1198_v30 }
  0xaf   :  { %2619 = vst [vmem:[#allocation17_spill] sm:$0xff] %v1286_v44  ;;  %2620 = vst [vmem:[#allocation18_spill] sm:$0xff] %v1288_v45 }
  0xb0   :  { %v1200_v31 = vld [vmem:[#allocation2 + $0x30] sm:$0xff]  ;;  %v1206_v32 = vld [vmem:[#allocation2 + $0x38] sm:$0xff] }
  0xb1   :  { %146 = vrot.lane.b32.xlu1 %v1198_v30, %s1123_s27  ;;  %148 = vrot.lane.b32.xlu0 %v1200_v31, %s1123_s27  ;;  %v1248_v39 = vld [vmem:[#allocation2 + $0x31] sm:$0xff]  ;;  %v1254_v40 = vld [vmem:[#allocation2 + $0x39] sm:$0xff] }
  0xb2   :  { %2614 = vst [vmem:[#allocation12_spill] sm:$0xff] %v1248_v39  ;;  %2615 = vst [vmem:[#allocation13_spill] sm:$0xff] %v1254_v40  ;;  %v1294_v46 = vld [vmem:[#allocation2 + $0x2a] sm:$0xff]  ;;  %v1296_v47 = vld [vmem:[#allocation2 + $0x32] sm:$0xff] }
  0xb3   :  { %2621 = vst [vmem:[#allocation19_spill] sm:$0xff] %v1294_v46  ;;  %2622 = vst [vmem:[#allocation20_spill] sm:$0xff] %v1296_v47  ;;  %v1302_v48 = vld [vmem:[#allocation2 + $0x3a] sm:$0xff] }
  0xb4   :  { %2623 = vst [vmem:[#allocation21_spill] sm:$0xff] %v1302_v48 }
  0xb5   :  { %150 = vrot.lane.b32.xlu1 %v1206_v32, %s1123_s27  ;;  %264 = vrot.lane.b32.xlu0 %v1174_v22, %s1124_s28 }
  0xb9   :  { %266 = vrot.lane.b32.xlu1 %v1180_v25, %s1124_s28  ;;  %268 = vrot.lane.b32.xlu0 %v1182_v26, %s1124_s28  ;;  %v230_v25 = vmul.f32 %v1391_v9, %v1190_v28 }
  0xbd   :  { %270 = vrot.lane.b32.xlu1 %v1190_v28, %s1124_s28  ;;  %272 = vrot.lane.b32.xlu0 %v1192_v29, %s1124_s28  ;;  %v253_v29 = vmul.f32 %v1395_v10, %v1198_v30 }
  0xc1   :  { %274 = vrot.lane.b32.xlu1 %v1198_v30, %s1124_s28  ;;  %276 = vrot.lane.b32.xlu0 %v1200_v31, %s1124_s28 }
  0xc5   :  { %278 = vrot.lane.b32.xlu1 %v1206_v32, %s1124_s28  ;;  %361 = vrot.lane.b32.xlu0 %v1224_v33, %s1123_s27 }
  0xc9   :  { %363 = vrot.lane.b32.xlu1 %v1230_v34, %s1123_s27  ;;  %365 = vrot.lane.b32.xlu0 %v1232_v35, %s1123_s27 }
  0xcd   :  { %367 = vrot.lane.b32.xlu1 %v1238_v36, %s1123_s27  ;;  %369 = vrot.lane.b32.xlu0 %v1240_v37, %s1123_s27 }
  0xd1   :  { %371 = vrot.lane.b32.xlu1 %v1246_v38, %s1123_s27  ;;  %373 = vrot.lane.b32.xlu0 %v1248_v39, %s1123_s27 }
  0xd5   :  { %375 = vrot.lane.b32.xlu1 %v1254_v40, %s1123_s27  ;;  %511 = vrot.lane.b32.xlu0 %v1224_v33, %s1124_s28 }
  0xd9   :  { %513 = vrot.lane.b32.xlu1 %v1230_v34, %s1124_s28  ;;  %515 = vrot.lane.b32.xlu0 %v1232_v35, %s1124_s28 }
  0xdd   :  { %517 = vrot.lane.b32.xlu1 %v1238_v36, %s1124_s28  ;;  %519 = vrot.lane.b32.xlu0 %v1240_v37, %s1124_s28 }
  0xe1   :  { %521 = vrot.lane.b32.xlu1 %v1246_v38, %s1124_s28  ;;  %523 = vrot.lane.b32.xlu0 %v1248_v39, %s1124_s28  ;;  %v409_v39 = vstv %s1585_s5 }
  0xe5   :  { %525 = vrot.lane.b32.xlu1 %v1254_v40, %s1124_s28  ;;  %606 = vrot.lane.b32.xlu0 %v1272_v41, %s1123_s27 }
  0xe9   :  { %608 = vrot.lane.b32.xlu1 %v1278_v42, %s1123_s27  ;;  %610 = vrot.lane.b32.xlu0 %v1280_v43, %s1123_s27 }
  0xed   :  { %612 = vrot.lane.b32.xlu1 %v1286_v44, %s1123_s27  ;;  %614 = vrot.lane.b32.xlu0 %v1288_v45, %s1123_s27 }
  0xf1   :  { %616 = vrot.lane.b32.xlu1 %v1294_v46, %s1123_s27  ;;  %618 = vrot.lane.b32.xlu0 %v1296_v47, %s1123_s27 }
  0xf5   :  { %620 = vrot.lane.b32.xlu1 %v1302_v48, %s1123_s27  ;;  %756 = vrot.lane.b32.xlu0 %v1272_v41, %s1124_s28  ;;  %s1543_s27 = sld [smem:[#allocation6 + $0x26]] }
  0xf9   :  { %758 = vrot.lane.b32.xlu1 %v1278_v42, %s1124_s28  ;;  %760 = vrot.lane.b32.xlu0 %v1280_v43, %s1124_s28  ;;  %v408_v43 = vstv %s1582_s4 }
  0xfd   :  { %762 = vrot.lane.b32.xlu1 %v1286_v44, %s1124_s28  ;;  %764 = vrot.lane.b32.xlu0 %v1288_v45, %s1124_s28  ;;  %v387_v44 = vstv %s1565_s29  ;;  %s1031_s29 = sld [smem:[#allocation7 + $0x1]] }
 0x101   :  { %766 = vrot.lane.b32.xlu1 %v1294_v46, %s1124_s28  ;;  %768 = vrot.lane.b32.xlu0 %v1296_v47, %s1124_s28  ;;  %v1652_v47 = vmul.f32 %v1413_v14, %v1230_v34 }
 0x105   :  { %770 = vrot.lane.b32.xlu1 %v1302_v48, %s1124_s28  ;;  %s1549_s28 = sld [smem:[#allocation6 + $0x2f]] }
 0x117   :  { %v137_v21 = vpop.permute.xlu0 %136 }
 0x118   :  { %v154_v51 = vsel %vm1407_vm3, 0.0, %v137_v21 }
 0x119   :  { %v167_v22 = vmul.f32 %v1422_v17, %v154_v51  ;;  %v180_v56 = vmul.f32 %v1426_v18, %v154_v51  ;;  %v193_v57 = vmul.f32 %v1430_v19, %v154_v51  ;;  %v232_v51 = vmul.f32 %v1391_v9, %v1198_v30 }
 0x11b   :  { %v1463_v63 = vadd.f32 %v206_v20, %v167_v22  ;;  %v1465_v0 = vadd.f32 %v227_v23, %v180_v56  ;;  %v1467_v1 = vadd.f32 %v248_v24, %v193_v57  ;;  %v139_v2 = vpop.permute.xlu1 %138  ;;  %v141_v26 = vpop.permute.xlu0 %140 }
 0x11c   :  { %v155_v4 = vsel %vm1407_vm3, 0.0, %v139_v2  ;;  %v156_v28 = vsel %vm1407_vm3, 0.0, %v141_v26 }
 0x11d   :  { %v168_v7 = vmul.f32 %v1422_v17, %v155_v4  ;;  %v181_v8 = vmul.f32 %v1426_v18, %v155_v4  ;;  %v194_v20 = vmul.f32 %v1430_v19, %v155_v4  ;;  %v169_v21 = vmul.f32 %v1422_v17, %v156_v28 }
 0x11e   :  { %v182_v23 = vmul.f32 %v1426_v18, %v156_v28  ;;  %v195_v24 = vmul.f32 %v1430_v19, %v156_v28 }
 0x11f   :  { %v1491_v22 = vadd.f32 %v207_v27, %v168_v7  ;;  %v1493_v56 = vadd.f32 %v228_v49, %v181_v8  ;;  %v1495_v57 = vadd.f32 %v249_v52, %v194_v20  ;;  %v1497_v2 = vadd.f32 %v208_v54, %v169_v21  ;;  %v143_v26 = vpop.permute.xlu1 %142  ;;  %v145_v4 = vpop.permute.xlu0 %144 }
 0x120   :  { %v1501_v28 = vadd.f32 %v229_v55, %v182_v23  ;;  %v1503_v16 = vadd.f32 %v250_v58, %v195_v24  ;;  %v157_v30 = vsel %vm1407_vm3, 0.0, %v143_v26  ;;  %v158_v27 = vsel %vm1407_vm3, 0.0, %v145_v4 }
 0x121   :  { %v170_v49 = vmul.f32 %v1422_v17, %v157_v30  ;;  %v183_v52 = vmul.f32 %v1426_v18, %v157_v30  ;;  %v196_v54 = vmul.f32 %v1430_v19, %v157_v30  ;;  %v171_v7 = vmul.f32 %v1422_v17, %v158_v27 }
 0x122   :  { %v184_v55 = vmul.f32 %v1426_v18, %v158_v27  ;;  %v197_v58 = vmul.f32 %v1430_v19, %v158_v27  ;;  %v212_v8 = vmul.f32 %v1368_v53, %v1200_v31  ;;  %v233_v20 = vmul.f32 %v1391_v9, %v1200_v31 }
 0x123   :  { %v1525_v21 = vadd.f32 %v209_v59, %v170_v49  ;;  %v1527_v23 = vadd.f32 %v230_v25, %v183_v52  ;;  %v1529_v24 = vadd.f32 %v251_v60, %v196_v54  ;;  %v1531_v26 = vadd.f32 %v210_v62, %v171_v7  ;;  %v147_v4 = vpop.permute.xlu1 %146  ;;  %v149_v30 = vpop.permute.xlu0 %148 }
 0x124   :  { %v1535_v27 = vadd.f32 %v231_v3, %v184_v55  ;;  %v1537_v61 = vadd.f32 %v252_v5, %v197_v58  ;;  %v159_v48 = vsel %vm1407_vm3, 0.0, %v147_v4  ;;  %v160_v59 = vsel %vm1407_vm3, 0.0, %v149_v30 }
 0x125   :  { %v172_v25 = vmul.f32 %v1422_v17, %v159_v48  ;;  %v185_v60 = vmul.f32 %v1426_v18, %v159_v48  ;;  %v198_v62 = vmul.f32 %v1430_v19, %v159_v48  ;;  %v173_v49 = vmul.f32 %v1422_v17, %v160_v59 }
 0x126   :  { %v254_v3 = vmul.f32 %v1395_v10, %v1200_v31  ;;  %v186_v5 = vmul.f32 %v1426_v18, %v160_v59  ;;  %v199_v52 = vmul.f32 %v1430_v19, %v160_v59  ;;  %v213_v54 = vmul.f32 %v1368_v53, %v1206_v32 }
 0x127   :  { %v1557_v7 = vadd.f32 %v211_v6, %v172_v25  ;;  %v1559_v55 = vadd.f32 %v232_v51, %v185_v60  ;;  %v1561_v48 = vadd.f32 %v253_v29, %v198_v62  ;;  %v1563_v58 = vadd.f32 %v212_v8, %v173_v49  ;;  %v151_v4 = vpop.permute.xlu1 %150  ;;  %v265_v30 = vpop.permute.xlu0 %264 }
 0x128   :  { %v1567_v31 = vadd.f32 %v233_v20, %v186_v5  ;;  %v1569_v59 = vadd.f32 %v254_v3, %v199_v52  ;;  %v234_v53 = vmul.f32 %v1391_v9, %v1206_v32  ;;  %v161_v6 = vsel %vm1407_vm3, 0.0, %v151_v4 }
 0x129   :  { %v255_v51 = vmul.f32 %v1395_v10, %v1206_v32  ;;  %v174_v29 = vmul.f32 %v1422_v17, %v161_v6  ;;  %v187_v8 = vmul.f32 %v1426_v18, %v161_v6  ;;  %v200_v20 = vmul.f32 %v1430_v19, %v161_v6 }
 0x12a   :  { %v292_v9 = vstv %s1509_s24  ;;  %v1589_v25 = vmul.f32 %v1399_v11, %v1224_v33  ;;  %v293_v19 = vstv %s1515_s25  ;;  %v313_v3 = vstv %s1523_s26  ;;  %s1930_s24 = sld [smem:[#allocation6 + $0x11]] }
 0x12b   :  { %v1593_v10 = vadd.f32 %v213_v54, %v174_v29  ;;  %v1595_v17 = vadd.f32 %v234_v53, %v187_v8  ;;  %v1597_v18 = vadd.f32 %v255_v51, %v200_v20  ;;  %v267_v62 = vpop.permute.xlu1 %266  ;;  %v269_v49 = vpop.permute.xlu0 %268  ;;  %v314_v5 = vstv %s1533_s0  ;;  %s2276_s25 = sld [smem:[#allocation6 + $0x35]] }
 0x12c   :  { %v1608_v52 = vmul.f32 %v1403_v12, %v1224_v33  ;;  %v1612_v54 = vmul.f32 %v1413_v14, %v1224_v33  ;;  %v2633_v4 = vand.u32 63, %v1352_v50  ;;  %v334_v6 = vstv %s1543_s27  ;;  %s867_s26 = sld [smem:[#allocation7]] }
 0x12d   :  { %2630 = vst [vmem:[#allocation26_spill] sm:$0xff] %v1593_v10  ;;  %2631 = vst [vmem:[#allocation27_spill] sm:$0xff] %v1595_v17  ;;  %v335_v51 = vstv %s1549_s28  ;;  %v1624_v29 = vmul.f32 %v1399_v11, %v1232_v35  ;;  %v1628_v8 = vsel %vm125_vm2, %v292_v9, %v293_v19  ;;  %v1632_v33 = vmul.f32 %v1399_v11, %v1230_v34 }
 0x12e   :  { %2632 = vst [vmem:[#allocation28_spill] sm:$0xff] %v1597_v18  ;;  %vm1616_vm4 = vcmp.eq.s32.totalorder %v2633_v4, 63  ;;  %v1636_v20 = vmul.f32 %v1403_v12, %v1232_v35  ;;  %v1640_v4 = vmul.f32 %v1413_v14, %v1232_v35  ;;  %v1644_v32 = vsel %vm125_vm2, %v313_v3, %v314_v5 }
 0x12f   :  { %v271_v9 = vpop.permute.xlu1 %270  ;;  %v273_v19 = vpop.permute.xlu0 %272  ;;  %v1648_v60 = vmul.f32 %v1403_v12, %v1230_v34  ;;  %v1656_v35 = vmul.f32 %v1399_v11, %v1238_v36  ;;  %v1660_v46 = vsel %vm125_vm2, %v334_v6, %v335_v51  ;;  %v282_v3 = vsel %vm1616_vm4, 0.0, %v265_v30 }
 0x130   :  { %v1666_v5 = vmul.f32 %v1403_v12, %v1238_v36  ;;  %v1670_v34 = vmul.f32 %v1413_v14, %v1238_v36  ;;  %v283_v45 = vsel %vm1616_vm4, 0.0, %v267_v62  ;;  %v1676_v6 = vmul.f32 %v1399_v11, %v1240_v37 }
 0x131   :  { %v1680_v30 = vmul.f32 %v1403_v12, %v1240_v37  ;;  %v1684_v51 = vmul.f32 %v1413_v14, %v1240_v37  ;;  %v388_v36 = vstv %s1575_s30  ;;  %v1691_v62 = vmul.f32 %v1399_v11, %v1246_v38 }
 0x132   :  { %2636 = vst [vmem:[#allocation29_spill] sm:$0xff] %v1666_v5  ;;  %2637 = vst [vmem:[#allocation30_spill] sm:$0xff] %v1670_v34  ;;  %v295_v42 = vmul.f32 %v1628_v8, %v282_v3  ;;  %v316_v15 = vmul.f32 %v1644_v32, %v282_v3  ;;  %v284_v41 = vsel %vm1616_vm4, 0.0, %v269_v49  ;;  %v337_v37 = vmul.f32 %v1660_v46, %v282_v3 }
 0x133   :  { %2638 = vst [vmem:[#allocation31_spill] sm:$0xff] %v1676_v6  ;;  %2639 = vst [vmem:[#allocation32_spill] sm:$0xff] %v1680_v30  ;;  %v275_v40 = vpop.permute.xlu1 %274  ;;  %v277_v18 = vpop.permute.xlu0 %276  ;;  %v296_v17 = vmul.f32 %v1628_v8, %v283_v45  ;;  %v430_v30 = vstv %s1604_s7  ;;  %v317_v6 = vmul.f32 %v1644_v32, %v283_v45  ;;  %v338_v11 = vmul.f32 %v1660_v46, %v283_v45 }
 0x134   :  { %2640 = vst [vmem:[#allocation33_spill] sm:$0xff] %v1684_v51  ;;  %2641 = vst [vmem:[#allocation34_spill] sm:$0xff] %v1691_v62  ;;  %v429_v51 = vstv %s1600_s6  ;;  %v1706_v62 = vmul.f32 %v1403_v12, %v1246_v38  ;;  %v1710_v49 = vmul.f32 %v1413_v14, %v1246_v38  ;;  %v297_v34 = vmul.f32 %v1628_v8, %v284_v41 }
 0x135   :  { %v318_v3 = vmul.f32 %v1644_v32, %v284_v41  ;;  %v1716_v5 = vsel %vm125_vm2, %v387_v44, %v388_v36  ;;  %v1720_v10 = vsel %vm125_vm2, %v408_v43, %v409_v39  ;;  %v303_v45 = vadd.f32 %v295_v42, %v1463_v63 }
 0x136   :  { %2642 = vst [vmem:[#allocation35_spill] sm:$0xff] %v1706_v62  ;;  %2643 = vst [vmem:[#allocation36_spill] sm:$0xff] %v1710_v49  ;;  %v324_v62 = vadd.f32 %v316_v15, %v1465_v0  ;;  %v339_v12 = vmul.f32 %v1660_v46, %v284_v41  ;;  %v1729_v49 = vsel %vm125_vm2, %v429_v51, %v430_v30  ;;  %v285_v39 = vsel %vm1616_vm4, 0.0, %v271_v9 }
 0x137   :  { %v1725_v38 = vpop.permute.xlu1 %278  ;;  %v362_v14 = vpop.permute.xlu0 %361  ;;  %v345_v44 = vadd.f32 %v337_v37, %v1467_v1  ;;  %v304_v36 = vadd.f32 %v296_v17, %v1491_v22  ;;  %v325_v43 = vadd.f32 %v317_v6, %v1493_v56  ;;  %v346_v41 = vadd.f32 %v338_v11, %v1495_v57 }
 0x138   :  { %v377_v42 = vsel %vm1407_vm3, 0.0, %v362_v14  ;;  %v286_v15 = vsel %vm1616_vm4, 0.0, %v273_v19  ;;  %v305_v0 = vadd.f32 %v297_v34, %v1497_v2  ;;  %v326_v1 = vadd.f32 %v318_v3, %v1501_v28 }
 0x139   :  { %v390_v63 = vmul.f32 %v1716_v5, %v377_v42  ;;  %v411_v22 = vmul.f32 %v1720_v10, %v377_v42  ;;  %v432_v17 = vmul.f32 %v1729_v49, %v377_v42  ;;  %v347_v9 = vadd.f32 %v339_v12, %v1503_v16 }
 0x13a   :  { %v298_v14 = vmul.f32 %v1628_v8, %v285_v39  ;;  %v319_v56 = vmul.f32 %v1644_v32, %v285_v39  ;;  %v340_v19 = vmul.f32 %v1660_v46, %v285_v39  ;;  %v299_v30 = vmul.f32 %v1628_v8, %v286_v15 }
 0x13b   :  { %v398_v11 = vadd.f32 %v390_v63, %v303_v45  ;;  %v364_v57 = vpop.permute.xlu1 %363  ;;  %v366_v6 = vpop.permute.xlu0 %365  ;;  %v419_v2 = vadd.f32 %v411_v22, %v324_v62  ;;  %v287_v34 = vsel %vm1616_vm4, 0.0, %v275_v40  ;;  %v440_v51 = vadd.f32 %v432_v17, %v345_v44 }
 0x13c   :  { %v378_v28 = vsel %vm1407_vm3, 0.0, %v364_v57  ;;  %v379_v16 = vsel %vm1407_vm3, 0.0, %v366_v6  ;;  %v306_v39 = vadd.f32 %v298_v14, %v1525_v21  ;;  %v320_v40 = vmul.f32 %v1644_v32, %v286_v15 }
 0x13d   :  { %v391_v12 = vmul.f32 %v1716_v5, %v378_v28  ;;  %v412_v37 = vmul.f32 %v1720_v10, %v378_v28  ;;  %v433_v3 = vmul.f32 %v1729_v49, %v378_v28  ;;  %v1761_v45 = vadd.f32 %v1589_v25, %v398_v11 }
 0x13e   :  { %v1764_v62 = vadd.f32 %v1608_v52, %v419_v2  ;;  %v341_v44 = vmul.f32 %v1660_v46, %v286_v15  ;;  %v327_v17 = vadd.f32 %v319_v56, %v1527_v23  ;;  %v348_v57 = vadd.f32 %v340_v19, %v1529_v24 }
 0x13f   :  { %v399_v42 = vadd.f32 %v391_v12, %v304_v36  ;;  %v368_v63 = vpop.permute.xlu1 %367  ;;  %v370_v22 = vpop.permute.xlu0 %369  ;;  %v307_v6 = vadd.f32 %v299_v30, %v1531_v26  ;;  %v288_v25 = vsel %vm1616_vm4, 0.0, %v277_v18  ;;  %v300_v52 = vmul.f32 %v1628_v8, %v287_v34 }
 0x140   :  { %v321_v21 = vmul.f32 %v1644_v32, %v287_v34  ;;  %v392_v14 = vmul.f32 %v1716_v5, %v379_v16  ;;  %v413_v15 = vmul.f32 %v1720_v10, %v379_v16  ;;  %v420_v36 = vadd.f32 %v412_v37, %v325_v43 }
 0x141   :  { %v441_v11 = vadd.f32 %v433_v3, %v346_v41  ;;  %v1779_v2 = vadd.f32 %v1612_v54, %v440_v51  ;;  %v1782_v23 = vadd.f32 %v1632_v33, %v399_v42  ;;  %v328_v24 = vadd.f32 %v320_v40, %v1535_v27 }
 0x142   :  { %v342_v26 = vmul.f32 %v1660_v46, %v287_v34  ;;  %v301_v18 = vmul.f32 %v1628_v8, %v288_v25  ;;  %v380_v56 = vsel %vm1407_vm3, 0.0, %v368_v63  ;;  %v349_v43 = vadd.f32 %v341_v44, %v1537_v61 }
 0x143   :  { %v372_v19 = vpop.permute.xlu1 %371  ;;  %v374_v30 = vpop.permute.xlu0 %373  ;;  %v322_v41 = vmul.f32 %v1644_v32, %v288_v25  ;;  %v343_v54 = vmul.f32 %v1660_v46, %v288_v25  ;;  %v434_v33 = vmul.f32 %v1729_v49, %v379_v16  ;;  %v308_v28 = vadd.f32 %v300_v52, %v1557_v7 }
 0x144   :  { %v329_v27 = vadd.f32 %v321_v21, %v1559_v55  ;;  %v400_v34 = vadd.f32 %v392_v14, %v305_v0  ;;  %v421_v51 = vadd.f32 %v413_v15, %v326_v1  ;;  %v393_v12 = vmul.f32 %v1716_v5, %v380_v56 }
 0x145   :  { %v381_v37 = vsel %vm1407_vm3, 0.0, %v370_v22  ;;  %v1799_v3 = vadd.f32 %v1648_v60, %v420_v36  ;;  %v1802_v61 = vadd.f32 %v1652_v47, %v441_v11  ;;  %v350_v40 = vadd.f32 %v342_v26, %v1561_v48 }
 0x146   :  { %v309_v16 = vadd.f32 %v301_v18, %v1563_v58  ;;  %v289_v7 = vsel %vm1616_vm4, 0.0, %v1725_v38  ;;  %v414_v55 = vmul.f32 %v1720_v10, %v380_v56  ;;  %v330_v44 = vadd.f32 %v322_v41, %v1567_v31 }
 0x147   :  { %2644 = vst [vmem:[#allocation37_spill] sm:$0xff] %v1802_v61  ;;  %v376_v0 = vpop.permute.xlu1 %375  ;;  %v1810_v1 = vpop.permute.xlu0 %511  ;;  %v442_v60 = vadd.f32 %v434_v33, %v347_v9  ;;  %v435_v42 = vmul.f32 %v1729_v49, %v380_v56  ;;  %v382_v47 = vsel %vm1407_vm3, 0.0, %v372_v19  ;;  %v351_v48 = vadd.f32 %v343_v54, %v1569_v59 }
 0x148   :  { %v394_v58 = vmul.f32 %v1716_v5, %v381_v37  ;;  %v415_v38 = vmul.f32 %v1720_v10, %v381_v37  ;;  %v436_v63 = vmul.f32 %v1729_v49, %v381_v37  ;;  %v302_v31 = vmul.f32 %v1628_v8, %v289_v7 }
 0x149   :  { %v401_v9 = vadd.f32 %v393_v12, %v306_v39  ;;  %v1828_v22 = vadd.f32 %v1624_v29, %v400_v34  ;;  %v1831_v25 = vadd.f32 %v1636_v20, %v421_v51  ;;  %v323_v59 = vmul.f32 %v1644_v32, %v289_v7 }
 0x14a   :  { %v422_v52 = vadd.f32 %v414_v55, %v327_v17  ;;  %v395_v21 = vmul.f32 %v1716_v5, %v382_v47  ;;  %v383_v14 = vsel %vm1407_vm3, 0.0, %v374_v30  ;;  %v443_v15 = vadd.f32 %v435_v42, %v348_v57  ;;  %v2651_v55 = vld [vmem:[#allocation32_spill] sm:$0xff] }
 0x14b   :  { %v1839_v8 = vpop.permute.xlu1 %513  ;;  %v1841_v39 = vpop.permute.xlu0 %515  ;;  %v416_v29 = vmul.f32 %v1720_v10, %v382_v47  ;;  %v437_v20 = vmul.f32 %v1729_v49, %v382_v47  ;;  %v1848_v32 = vadd.f32 %v1640_v4, %v442_v60  ;;  %v402_v17 = vadd.f32 %v394_v58, %v307_v6  ;;  %v2646_v4 = vld [vmem:[#allocation26_spill] sm:$0xff]  ;;  %v2653_v60 = vld [vmem:[#allocation33_spill] sm:$0xff]  ;;  %v2655_v58 = vld [vmem:[#allocation27_spill] sm:$0xff] }
 0x14c   :  { %v423_v36 = vadd.f32 %v415_v38, %v328_v24  ;;  %v444_v11 = vadd.f32 %v436_v63, %v349_v43  ;;  %v384_v26 = vsel %vm1407_vm3, 0.0, %v376_v0  ;;  %v396_v18 = vmul.f32 %v1716_v5, %v383_v14  ;;  %v2647_v43 = vld [vmem:[#allocation29_spill] sm:$0xff]  ;;  %v2656_v38 = vld [vmem:[#allocation34_spill] sm:$0xff] }
 0x14d   :  { %2645 = vst [vmem:[#allocation38_spill] sm:$0xff] %v1848_v32  ;;  %v417_v57 = vmul.f32 %v1720_v10, %v383_v14  ;;  %v438_v56 = vmul.f32 %v1729_v49, %v383_v14  ;;  %v1860_v19 = vadd.f32 %v1656_v35, %v401_v9  ;;  %v310_v6 = vadd.f32 %v302_v31, %v2646_v4  ;;  %v2648_v35 = vld [vmem:[#allocation30_spill] sm:$0xff]  ;;  %v2657_v9 = vld [vmem:[#allocation12_spill] sm:$0xff]  ;;  %v2659_v14 = vld [vmem:[#allocation23_spill] sm:$0xff] }
 0x14e   :  { %v344_v24 = vmul.f32 %v1660_v46, %v289_v7  ;;  %v403_v30 = vadd.f32 %v395_v21, %v308_v28  ;;  %v1865_v41 = vadd.f32 %v2647_v43, %v422_v52  ;;  %v424_v34 = vadd.f32 %v416_v29, %v329_v27  ;;  %v2650_v28 = vld [vmem:[#allocation31_spill] sm:$0xff]  ;;  %v2658_v52 = vld [vmem:[#allocation22_spill] sm:$0xff] }
 0x14f   :  { %v1867_v54 = vpop.permute.xlu1 %517  ;;  %v1869_v33 = vpop.permute.xlu0 %519  ;;  %v445_v51 = vadd.f32 %v437_v20, %v350_v40  ;;  %v397_v12 = vmul.f32 %v1716_v5, %v384_v26  ;;  %v1875_v37 = vadd.f32 %v2648_v35, %v443_v15  ;;  %v418_v46 = vmul.f32 %v1720_v10, %v384_v26  ;;  %v2663_v20 = vld [vmem:[#allocation24_spill] sm:$0xff] }
 0x150   :  { %v1881_v7 = vadd.f32 %v2650_v28, %v402_v17  ;;  %v1884_v0 = vadd.f32 %v2651_v55, %v423_v36  ;;  %v1887_v42 = vadd.f32 %v2653_v60, %v444_v11  ;;  %v404_v27 = vadd.f32 %v396_v18, %v309_v16  ;;  %v2664_v11 = vld [vmem:[#allocation36_spill] sm:$0xff]  ;;  %v2666_v18 = vld [vmem:[#allocation13_spill] sm:$0xff] }
 0x151   :  { %2649 = vst [vmem:[#allocation26_spill] sm:$0xff] %v1875_v37  ;;  %v425_v5 = vadd.f32 %v417_v57, %v330_v44  ;;  %v446_v40 = vadd.f32 %v438_v56, %v351_v48  ;;  %v439_v47 = vmul.f32 %v1729_v49, %v384_v26  ;;  %v331_v10 = vadd.f32 %v323_v59, %v2655_v58  ;;  %v2660_v49 = vld [vmem:[#allocation28_spill] sm:$0xff]  ;;  %v2661_v59 = vld [vmem:[#allocation35_spill] sm:$0xff] }
 0x152   :  { %2652 = vst [vmem:[#allocation29_spill] sm:$0xff] %v1884_v0  ;;  %2654 = vst [vmem:[#allocation30_spill] sm:$0xff] %v1887_v42  ;;  %v1896_v63 = vadd.f32 %v2656_v38, %v403_v30  ;;  %v459_v21 = vmul.f32 %v2658_v52, %v2657_v9  ;;  %v480_v16 = vmul.f32 %v2659_v14, %v2657_v9  ;;  %v738_v56 = vstv %s1816_s8  ;;  %v2683_v42 = vld [vmem:[#allocation21_spill] sm:$0xff] }
 0x153   :  { %v1898_v31 = vpop.permute.xlu1 %521  ;;  %v1904_v44 = vpop.permute.xlu0 %523  ;;  %v352_v48 = vadd.f32 %v344_v24, %v2660_v49  ;;  %v405_v15 = vadd.f32 %v397_v12, %v310_v6  ;;  %v1910_v29 = vadd.f32 %v2661_v59, %v424_v34  ;;  %v501_v17 = vmul.f32 %v2663_v20, %v2657_v9  ;;  %v2678_v49 = vld [vmem:[#allocation17_spill] sm:$0xff] }
 0x154   :  { %v426_v36 = vadd.f32 %v418_v46, %v331_v10  ;;  %v1917_v26 = vadd.f32 %v2664_v11, %v445_v51  ;;  %v460_v57 = vmul.f32 %v2658_v52, %v2666_v18  ;;  %v1924_v6 = vadd.f32 %v459_v21, %v404_v27  ;;  %v2674_v10 = vld [vmem:[#allocation15_spill] sm:$0xff] }
 0x155   :  { %2662 = vst [vmem:[#allocation31_spill] sm:$0xff] %v1910_v29  ;;  %v447_v4 = vadd.f32 %v439_v47, %v352_v48  ;;  %v1926_v24 = vadd.f32 %v480_v16, %v425_v5  ;;  %v1928_v30 = vadd.f32 %v501_v17, %v446_v40  ;;  %v481_v43 = vmul.f32 %v2659_v14, %v2666_v18  ;;  %v2672_v40 = vld [vmem:[#allocation14_spill] sm:$0xff]  ;;  %v2673_v47 = vld [vmem:[#allocation25_spill] sm:$0xff]  ;;  %v2677_v14 = vld [vmem:[#allocation16_spill] sm:$0xff] }
 0x156   :  { %2665 = vst [vmem:[#allocation32_spill] sm:$0xff] %v1917_v26  ;;  %v2669_v12 = vstv %s1489_s1  ;;  %v2670_v35 = vstv %s1364_s22  ;;  %v537_v28 = vstv %s1822_s9  ;;  %v538_v55 = vstv %s1825_s10  ;;  %s1985_s22 = sld [smem:[#allocation6 + $0x1a]] }
 0x157   :  { %2667 = vst [vmem:[#allocation33_spill] sm:$0xff] %v1926_v24  ;;  %2668 = vst [vmem:[#allocation27_spill] sm:$0xff] %v1928_v30  ;;  %v1934_v34 = vpop.permute.xlu1 %525  ;;  %v607_v51 = vpop.permute.xlu0 %606  ;;  %v1942_v46 = vsel %vm125_vm2, %v2670_v35, %v2669_v12  ;;  %v1946_v60 = vadd.f32 %v460_v57, %v405_v15  ;;  %v502_v27 = vmul.f32 %v2663_v20, %v2666_v18  ;;  %v2675_v9 = vstv %s1499_s23  ;;  %v2679_v15 = vld [vmem:[#allocation18_spill] sm:$0xff]  ;;  %v2680_v18 = vld [vmem:[#allocation19_spill] sm:$0xff]  ;;  %s1999_s1 = sld [smem:[#allocation6 + $0x23]] }
 0x158   :  { %v1950_v5 = vadd.f32 %v481_v43, %v426_v36  ;;  %v1954_v58 = vmul.f32 %v2673_v47, %v2672_v40  ;;  %v1958_v38 = vmul.f32 %v2673_v47, %v2674_v10  ;;  %v1964_v52 = vsel %vm125_vm2, %v2675_v9, %v738_v56  ;;  %v2681_v56 = vld [vmem:[#allocation20_spill] sm:$0xff]  ;;  %s2266_s23 = sld [smem:[#allocation6 + $0x2c]] }
 0x159   :  { %v1966_v21 = vadd.f32 %v502_v27, %v447_v4  ;;  %v1970_v16 = vmul.f32 %v2673_v47, %v2677_v14  ;;  %v1974_v48 = vmul.f32 %v2673_v47, %v2678_v49  ;;  %v1978_v59 = vmul.f32 %v2673_v47, %v2679_v15 }
 0x15a   :  { %2671 = vst [vmem:[#allocation34_spill] sm:$0xff] %v1950_v5  ;;  %v1982_v20 = vsel %vm125_vm2, %v537_v28, %v538_v55  ;;  %v558_v17 = vstv %s1837_s11  ;;  %v1989_v57 = vmul.f32 %v2673_v47, %v2680_v18  ;;  %v1993_v4 = vmul.f32 %v2673_v47, %v2681_v56 }
 0x15b   :  { %2676 = vst [vmem:[#allocation12_spill] sm:$0xff] %v1966_v21  ;;  %v609_v36 = vpop.permute.xlu1 %608  ;;  %v611_v11 = vpop.permute.xlu0 %610  ;;  %v559_v43 = vstv %s1845_s12  ;;  %v579_v12 = vstv %s1852_s13  ;;  %v580_v35 = vstv %s1857_s14  ;;  %v632_v28 = vstv %s1871_s15 }
 0x15c   :  { %v527_v55 = vsel %vm1616_vm4, 0.0, %v1810_v1  ;;  %v633_v27 = vstv %s1877_s16  ;;  %v653_v10 = vstv %s1889_s17  ;;  %v654_v9 = vstv %s1892_s18 }
 0x15d   :  { %v674_v14 = vstv %s1906_s19  ;;  %v675_v49 = vstv %s1914_s20  ;;  %v782_v15 = vstv %s1921_s21  ;;  %v783_v18 = vstv %s1930_s24  ;;  %s1040_s19 = sld [smem:[#allocation7 + $0x2]] }
 0x15e   :  { %v2013_v56 = vsel %vm125_vm2, %v558_v17, %v559_v43  ;;  %v2017_v21 = vsel %vm125_vm2, %v579_v12, %v580_v35  ;;  %v2021_v1 = vmul.f32 %v2673_v47, %v2683_v42  ;;  %v2025_v37 = vmul.f32 %v1942_v46, %v2672_v40 }
 0x15f   :  { %2682 = vst [vmem:[#allocation22_spill] sm:$0xff] %v2017_v21  ;;  %v613_v30 = vpop.permute.xlu1 %612  ;;  %v615_v26 = vpop.permute.xlu0 %614  ;;  %v540_v32 = vmul.f32 %v1982_v20, %v527_v55  ;;  %v2031_v17 = vsel %vm1616_vm4, 0.0, %v1839_v8  ;;  %v2035_v43 = vsel %vm125_vm2, %v632_v28, %v633_v27  ;;  %v2039_v12 = vsel %vm1407_vm3, 0.0, %v607_v51 }
 0x160   :  { %v2044_v42 = vsel %vm1616_vm4, 0.0, %v1841_v39  ;;  %v2048_v40 = vsel %vm125_vm2, %v653_v10, %v654_v9  ;;  %v2052_v8 = vsel %vm125_vm2, %v674_v14, %v675_v49  ;;  %v2056_v47 = vsel %vm125_vm2, %v782_v15, %v783_v18 }
 0x161   :  { %v561_v51 = vmul.f32 %v2013_v56, %v527_v55  ;;  %v582_v35 = vmul.f32 %v2017_v21, %v527_v55  ;;  %v2063_v39 = vsel %vm1616_vm4, 0.0, %v1867_v54  ;;  %v2067_v28 = vsel %vm1407_vm3, 0.0, %v609_v36 }
 0x162   :  { %v541_v27 = vmul.f32 %v1982_v20, %v2031_v17  ;;  %v2074_v10 = vsel %vm1616_vm4, 0.0, %v1869_v33  ;;  %v2079_v55 = vsel %vm1616_vm4, 0.0, %v1898_v31  ;;  %v635_v54 = vmul.f32 %v2035_v43, %v2039_v12 }
 0x163   :  { %v617_v9 = vpop.permute.xlu1 %616  ;;  %v619_v14 = vpop.permute.xlu0 %618  ;;  %v548_v36 = vadd.f32 %v540_v32, %v1761_v45  ;;  %v542_v49 = vmul.f32 %v1982_v20, %v2044_v42  ;;  %v543_v33 = vmul.f32 %v1982_v20, %v2063_v39  ;;  %v636_v61 = vmul.f32 %v2035_v43, %v2067_v28 }
 0x164   :  { %v2094_v31 = vsel %vm1407_vm3, 0.0, %v611_v11  ;;  %v2098_v5 = vsel %vm1407_vm3, 0.0, %v613_v30  ;;  %v569_v45 = vadd.f32 %v561_v51, %v1764_v62  ;;  %v544_v32 = vmul.f32 %v1982_v20, %v2074_v10 }
 0x165   :  { %v545_v15 = vmul.f32 %v1982_v20, %v2079_v55  ;;  %v2107_v18 = vsel %vm1407_vm3, 0.0, %v615_v26  ;;  %v2110_v21 = vadd.f32 %v582_v35, %v1779_v2  ;;  %v549_v11 = vadd.f32 %v541_v27, %v1782_v23 }
 0x166   :  { %2684 = vst [vmem:[#allocation23_spill] sm:$0xff] %v2107_v18  ;;  %v2116_v30 = vsel %vm1616_vm4, 0.0, %v1904_v44  ;;  %v643_v62 = vadd.f32 %v635_v54, %v548_v36  ;;  %v550_v29 = vadd.f32 %v542_v49, %v1828_v22  ;;  %v637_v0 = vmul.f32 %v2035_v43, %v2094_v31 }
 0x167   :  { %2685 = vst [vmem:[#allocation28_spill] sm:$0xff] %v2116_v30  ;;  %v621_v51 = vpop.permute.xlu1 %620  ;;  %v757_v24 = vpop.permute.xlu0 %756  ;;  %v638_v26 = vmul.f32 %v2035_v43, %v2098_v5  ;;  %v551_v23 = vadd.f32 %v543_v33, %v1860_v19  ;;  %v644_v35 = vadd.f32 %v636_v61, %v549_v11  ;;  %v639_v44 = vmul.f32 %v2035_v43, %v2107_v18 }
 0x168   :  { %v2125_v2 = vsel %vm1616_vm4, 0.0, %v757_v24  ;;  %v2132_v27 = vsel %vm1407_vm3, 0.0, %v617_v9  ;;  %v552_v22 = vadd.f32 %v544_v32, %v1881_v7  ;;  %v553_v54 = vadd.f32 %v545_v15, %v1896_v63 }
 0x169   :  { %v546_v36 = vmul.f32 %v1982_v20, %v2116_v30  ;;  %v785_v24 = vmul.f32 %v2056_v47, %v2125_v2  ;;  %v2143_v61 = vsel %vm1616_vm4, 0.0, %v1934_v34  ;;  %v656_v19 = vmul.f32 %v2048_v40, %v2039_v12 }
 0x16a   :  { %v2149_v9 = vsel %vm1407_vm3, 0.0, %v619_v14  ;;  %v706_v49 = vadd.f32 %v1954_v58, %v643_v62  ;;  %v645_v15 = vadd.f32 %v637_v0, %v550_v29  ;;  %v646_v33 = vadd.f32 %v638_v26, %v551_v23 }
 0x16b   :  { %v759_v7 = vpop.permute.xlu1 %758  ;;  %v761_v63 = vpop.permute.xlu0 %760  ;;  %v640_v32 = vmul.f32 %v2035_v43, %v2132_v27  ;;  %v647_v11 = vadd.f32 %v639_v44, %v552_v22  ;;  %v707_v18 = vadd.f32 %v1958_v38, %v644_v35  ;;  %v641_v0 = vmul.f32 %v2035_v43, %v2149_v9 }
 0x16c   :  { %v2156_v34 = vsel %vm1616_vm4, 0.0, %v759_v7  ;;  %v2162_v14 = vsel %vm1616_vm4, 0.0, %v761_v63  ;;  %v2169_v29 = vsel %vm1407_vm3, 0.0, %v621_v51  ;;  %v2173_v62 = vadd.f32 %v785_v24, %v706_v49 }
 0x16d   :  { %v786_v30 = vmul.f32 %v2056_v47, %v2156_v34  ;;  %v787_v58 = vmul.f32 %v2056_v47, %v2162_v14  ;;  %v554_v26 = vadd.f32 %v546_v36, %v1924_v6  ;;  %v547_v23 = vmul.f32 %v1982_v20, %v2143_v61 }
 0x16e   :  { %v664_v44 = vadd.f32 %v656_v19, %v569_v45  ;;  %v648_v7 = vadd.f32 %v640_v32, %v553_v54  ;;  %843 = vrot.lane.b32.xlu0 %v2173_v62, %s1121_s2  ;;  %v708_v6 = vadd.f32 %v1970_v16, %v645_v15  ;;  %v642_v20 = vmul.f32 %v2035_v43, %v2169_v29 }
 0x16f   :  { %v763_v22 = vpop.permute.xlu1 %762  ;;  %v765_v38 = vpop.permute.xlu0 %764  ;;  %v2178_v35 = vadd.f32 %v786_v30, %v707_v18  ;;  %v709_v30 = vadd.f32 %v1974_v48, %v646_v33  ;;  %v677_v54 = vmul.f32 %v2052_v8, %v2039_v12  ;;  %v649_v36 = vadd.f32 %v641_v0, %v554_v26 }
 0x170   :  { %v2184_v13 = vsel %vm1616_vm4, 0.0, %v763_v22  ;;  %v2188_v51 = vsel %vm1616_vm4, 0.0, %v765_v38  ;;  %v2202_v24 = vadd.f32 %v787_v58, %v708_v6  ;;  %v710_v16 = vadd.f32 %v1978_v59, %v647_v11 }
 0x171   :  { %v788_v18 = vmul.f32 %v2056_v47, %v2184_v13  ;;  %v789_v45 = vmul.f32 %v2056_v47, %v2188_v51  ;;  %845 = vrot.lane.b32.xlu1 %v2178_v35, %s1121_s2  ;;  %v562_v43 = vmul.f32 %v2013_v56, %v2031_v17  ;;  %v555_v19 = vadd.f32 %v547_v23, %v1946_v60 }
 0x172   :  { %v727_v32 = vadd.f32 %v2025_v37, %v664_v44  ;;  %v657_v48 = vmul.f32 %v2048_v40, %v2067_v28  ;;  %847 = vrot.lane.b32.xlu0 %v2202_v24, %s1121_s2  ;;  %v711_v0 = vadd.f32 %v1989_v57, %v648_v7  ;;  %v563_v58 = vmul.f32 %v2013_v56, %v2044_v42  ;;  %v2236_v44 = vld [vmem:[#allocation2 + $0xa] sm:$0xff] }
 0x173   :  { %v767_v63 = vpop.permute.xlu1 %766  ;;  %v769_v49 = vpop.permute.xlu0 %768  ;;  %v2208_v15 = vadd.f32 %v788_v18, %v709_v30  ;;  %v2223_v12 = vadd.f32 %v789_v45, %v710_v16  ;;  %v650_v33 = vadd.f32 %v642_v20, %v555_v19  ;;  %v685_v26 = vadd.f32 %v677_v54, %v2110_v21  ;;  %v1059_v30 = vld [vmem:[#allocation2 + $0x2] sm:$0xff] }
 0x174   :  { %v2217_v59 = vsel %vm1616_vm4, 0.0, %v767_v63  ;;  %v2221_v60 = vsel %vm1616_vm4, 0.0, %v769_v49  ;;  %v712_v23 = vadd.f32 %v1993_v4, %v649_v36  ;;  %v720_v22 = vmul.f32 %v2236_v44, %v1942_v46 }
 0x175   :  { %2686 = vst [vmem:[#allocation35_spill] sm:$0xff] %v2223_v12  ;;  %v790_v37 = vmul.f32 %v2056_v47, %v2217_v59  ;;  %v791_v11 = vmul.f32 %v2056_v47, %v2221_v60  ;;  %849 = vrot.lane.b32.xlu1 %v2208_v15, %s1121_s2  ;;  %v570_v38 = vadd.f32 %v562_v43, %v1799_v3  ;;  %v2687_v20 = vstv %s1999_s1 }
 0x176   :  { %v564_v6 = vmul.f32 %v2013_v56, %v2063_v39  ;;  %v2688_v18 = vstv %s1985_s22  ;;  %v658_v4 = vmul.f32 %v2048_v40, %v2094_v31  ;;  %851 = vrot.lane.b32.xlu0 %v2223_v12, %s1121_s2  ;;  %v740_v54 = vmul.f32 %v1059_v30, %v1964_v52 }
 0x177   :  { %v2249_v57 = vsel %vm125_vm2, %v2688_v18, %v2687_v20  ;;  %v771_v7 = vpop.permute.xlu1 %770  ;;  %v2251_v21 = vadd.f32 %v790_v37, %v711_v0  ;;  %v2261_v45 = vadd.f32 %v791_v11, %v712_v23  ;;  %v665_v36 = vadd.f32 %v657_v48, %v570_v38  ;;  %v2692_v11 = vld [vmem:[#allocation23_spill] sm:$0xff] }
 0x178   :  { %v2259_v3 = vsel %vm1616_vm4, 0.0, %v771_v7  ;;  %v659_v16 = vmul.f32 %v2048_v40, %v2098_v5  ;;  %v713_v53 = vadd.f32 %v2021_v1, %v650_v33  ;;  %v571_v19 = vadd.f32 %v563_v58, %v1831_v25  ;;  %v2293_v58 = vld [vmem:[#allocation2 + $0x12] sm:$0xff]  ;;  %v2305_v18 = vld [vmem:[#allocation2 + $0x22] sm:$0xff] }
 0x179   :  { %2689 = vst [vmem:[#allocation24_spill] sm:$0xff] %v2251_v21  ;;  %2690 = vst [vmem:[#allocation36_spill] sm:$0xff] %v2261_v45  ;;  %v792_v43 = vmul.f32 %v2056_v47, %v2259_v3  ;;  %853 = vrot.lane.b32.xlu1 %v2251_v21, %s1121_s2  ;;  %v565_v63 = vmul.f32 %v2013_v56, %v2074_v10  ;;  %v806_v49 = vmul.f32 %v2249_v57, %v2125_v2 }
 0x17a   :  { %v2280_v48 = vadd.f32 %v740_v54, %v685_v26  ;;  %v572_v37 = vadd.f32 %v564_v6, %v1865_v41  ;;  %v566_v47 = vmul.f32 %v2013_v56, %v2079_v55  ;;  %v807_v1 = vmul.f32 %v2249_v57, %v2156_v34  ;;  %855 = vrot.lane.b32.xlu0 %v2261_v45, %s1121_s2  ;;  %v2297_v26 = vld [vmem:[#allocation2 + $0x1a] sm:$0xff]  ;;  %v2694_v54 = vld [vmem:[#allocation28_spill] sm:$0xff] }
 0x17b   :  { %v2287_v33 = vadd.f32 %v792_v43, %v713_v53  ;;  %v666_v25 = vadd.f32 %v658_v4, %v571_v19  ;;  %v660_v0 = vmul.f32 %v2048_v40, %v2692_v11  ;;  %v721_v41 = vmul.f32 %v2293_v58, %v1942_v46  ;;  %v2693_v4 = vld [vmem:[#allocation29_spill] sm:$0xff]  ;;  %v2696_v19 = vld [vmem:[#allocation31_spill] sm:$0xff] }
 0x17c   :  { %v722_v23 = vmul.f32 %v2297_v26, %v1942_v46  ;;  %v667_v38 = vadd.f32 %v659_v16, %v572_v37  ;;  %v661_v6 = vmul.f32 %v2048_v40, %v2132_v27  ;;  %v728_v20 = vadd.f32 %v720_v22, %v665_v36 }
 0x17d   :  { %2691 = vst [vmem:[#allocation13_spill] sm:$0xff] %v2287_v33  ;;  %857 = vrot.lane.b32.xlu1 %v2287_v33, %s1121_s2  ;;  %v723_v7 = vmul.f32 %v2305_v18, %v1942_v46  ;;  %v573_v30 = vadd.f32 %v565_v63, %v2693_v4  ;;  %v567_v43 = vmul.f32 %v2013_v56, %v2694_v54  ;;  %v824_v45 = vstv %s2266_s23 }
 0x17e   :  { %v808_v16 = vmul.f32 %v2249_v57, %v2162_v14  ;;  %v2314_v53 = vadd.f32 %v806_v49, %v727_v32  ;;  %v574_v37 = vadd.f32 %v566_v47, %v2696_v19  ;;  %v568_v22 = vmul.f32 %v2013_v56, %v2143_v61  ;;  %v2327_v49 = vld [vmem:[#allocation2 + $0x2a] sm:$0xff] }
 0x17f   :  { %v809_v36 = vmul.f32 %v2249_v57, %v2184_v13  ;;  %v2321_v33 = vadd.f32 %v807_v1, %v728_v20  ;;  %v668_v63 = vadd.f32 %v660_v0, %v573_v30  ;;  %v662_v4 = vmul.f32 %v2048_v40, %v2149_v9  ;;  %v2698_v0 = vld [vmem:[#allocation33_spill] sm:$0xff] }
 0x180   :  { %2695 = vst [vmem:[#allocation14_spill] sm:$0xff] %v2314_v53  ;;  %885 = vrot.lane.b32.xlu0 %v2314_v53, %s1121_s2  ;;  %v729_v32 = vadd.f32 %v721_v41, %v666_v25  ;;  %v724_v47 = vmul.f32 %v2327_v49, %v1942_v46  ;;  %v669_v19 = vadd.f32 %v661_v6, %v574_v37  ;;  %v825_v30 = vstv %s2276_s25  ;;  %v2699_v53 = vld [vmem:[#allocation22_spill] sm:$0xff] }
 0x181   :  { %2697 = vst [vmem:[#allocation25_spill] sm:$0xff] %v2321_v33  ;;  %v663_v56 = vmul.f32 %v2048_v40, %v2169_v29  ;;  %887 = vrot.lane.b32.xlu1 %v2321_v33, %s1121_s2  ;;  %v730_v1 = vadd.f32 %v722_v23, %v667_v38  ;;  %v575_v20 = vadd.f32 %v567_v43, %v2698_v0  ;;  %v2700_v6 = vld [vmem:[#allocation34_spill] sm:$0xff] }
 0x182   :  { %v810_v25 = vmul.f32 %v2249_v57, %v2188_v51  ;;  %v2340_v41 = vadd.f32 %v808_v16, %v729_v32  ;;  %v583_v21 = vmul.f32 %v2699_v53, %v2031_v17  ;;  %v576_v37 = vadd.f32 %v568_v22, %v2700_v6  ;;  %v2351_v38 = vld [vmem:[#allocation2 + $0x32] sm:$0xff] }
 0x183   :  { %v811_v40 = vmul.f32 %v2249_v57, %v2217_v59  ;;  %v2347_v12 = vadd.f32 %v809_v36, %v730_v1  ;;  %v670_v33 = vadd.f32 %v662_v4, %v575_v20  ;;  %v731_v23 = vadd.f32 %v723_v7, %v668_v63  ;;  %v2359_v36 = vld [vmem:[#allocation2 + $0x3a] sm:$0xff] }
 0x184   :  { %889 = vrot.lane.b32.xlu0 %v2340_v41, %s1121_s2  ;;  %v725_v43 = vmul.f32 %v2351_v38, %v1942_v46  ;;  %v678_v17 = vmul.f32 %v2052_v8, %v2067_v28  ;;  %v671_v16 = vadd.f32 %v663_v56, %v576_v37  ;;  %v732_v22 = vadd.f32 %v724_v47, %v669_v19  ;;  %v2701_v56 = vld [vmem:[#allocation37_spill] sm:$0xff] }
 0x185   :  { %891 = vrot.lane.b32.xlu1 %v2347_v12, %s1121_s2  ;;  %v726_v4 = vmul.f32 %v2359_v36, %v1942_v46  ;;  %v584_v7 = vmul.f32 %v2699_v53, %v2044_v42  ;;  %v2367_v63 = vsel %vm125_vm2, %v824_v45, %v825_v30  ;;  %v812_v28 = vmul.f32 %v2249_v57, %v2221_v60 }
 0x186   :  { %v2371_v32 = vadd.f32 %v810_v25, %v731_v23  ;;  %v591_v1 = vadd.f32 %v583_v21, %v2701_v56  ;;  %v585_v47 = vmul.f32 %v2699_v53, %v2063_v39  ;;  %v813_v46 = vmul.f32 %v2249_v57, %v2259_v3  ;;  %v2702_v21 = vld [vmem:[#allocation38_spill] sm:$0xff] }
 0x187   :  { %v2378_v19 = vadd.f32 %v811_v40, %v732_v22  ;;  %v679_v50 = vmul.f32 %v2052_v8, %v2094_v31  ;;  %v733_v42 = vadd.f32 %v725_v43, %v670_v33  ;;  %v680_v0 = vmul.f32 %v2052_v8, %v2098_v5  ;;  %v2703_v25 = vld [vmem:[#allocation26_spill] sm:$0xff] }
 0x188   :  { %893 = vrot.lane.b32.xlu0 %v2371_v32, %s1121_s2  ;;  %v686_v45 = vadd.f32 %v678_v17, %v591_v1  ;;  %v734_v39 = vadd.f32 %v726_v4, %v671_v16  ;;  %v741_v57 = vmul.f32 %v2236_v44, %v1964_v52  ;;  %v592_v20 = vadd.f32 %v584_v7, %v2702_v21  ;;  %v2704_v17 = vld [vmem:[#allocation30_spill] sm:$0xff]  ;;  %v2705_v4 = vld [vmem:[#allocation32_spill] sm:$0xff] }
 0x189   :  { %895 = vrot.lane.b32.xlu1 %v2378_v19, %s1121_s2  ;;  %v586_v31 = vmul.f32 %v2699_v53, %v2074_v10  ;;  %v827_v30 = vmul.f32 %v2367_v63, %v2125_v2  ;;  %v2395_v33 = vadd.f32 %v812_v28, %v733_v42  ;;  %v593_v6 = vadd.f32 %v585_v47, %v2703_v25 }
 0x18a   :  { %v587_v5 = vmul.f32 %v2699_v53, %v2079_v55  ;;  %v828_v37 = vmul.f32 %v2367_v63, %v2156_v34  ;;  %v2402_v40 = vadd.f32 %v813_v46, %v734_v39  ;;  %v687_v44 = vadd.f32 %v679_v50, %v592_v20  ;;  %v2707_v50 = vld [vmem:[#allocation12_spill] sm:$0xff] }
 0x18b   :  { %v681_v23 = vmul.f32 %v2052_v8, %v2692_v11  ;;  %v742_v10 = vmul.f32 %v2293_v58, %v1964_v52  ;;  %v688_v2 = vadd.f32 %v680_v0, %v593_v6  ;;  %v682_v43 = vmul.f32 %v2052_v8, %v2132_v27 }
 0x18c   :  { %897 = vrot.lane.b32.xlu0 %v2395_v33, %s1121_s2  ;;  %v749_v55 = vadd.f32 %v741_v57, %v686_v45  ;;  %v743_v34 = vmul.f32 %v2297_v26, %v1964_v52  ;;  %v594_v16 = vadd.f32 %v586_v31, %v2704_v17  ;;  %v588_v11 = vmul.f32 %v2699_v53, %v2694_v54 }
 0x18d   :  { %899 = vrot.lane.b32.xlu1 %v2402_v40, %s1121_s2  ;;  %v829_v22 = vmul.f32 %v2367_v63, %v2162_v14  ;;  %v2422_v58 = vadd.f32 %v827_v30, %v2280_v48  ;;  %v595_v27 = vadd.f32 %v587_v5, %v2705_v4  ;;  %v589_v7 = vmul.f32 %v2699_v53, %v2143_v61  ;;  %v2706_v53 = vld [vmem:[#allocation27_spill] sm:$0xff]  ;;  %v2710_v4 = vld [vmem:[#allocation36_spill] sm:$0xff] }
 0x18e   :  { %v830_v28 = vmul.f32 %v2367_v63, %v2184_v13  ;;  %v2429_v26 = vadd.f32 %v828_v37, %v749_v55  ;;  %v689_v56 = vadd.f32 %v681_v23, %v594_v16  ;;  %v683_v54 = vmul.f32 %v2052_v8, %v2149_v9 }
 0x18f   :  { %v750_v14 = vadd.f32 %v742_v10, %v687_v44  ;;  %v690_v48 = vadd.f32 %v682_v43, %v595_v27  ;;  %v684_v1 = vmul.f32 %v2052_v8, %v2169_v29  ;;  %v751_v61 = vadd.f32 %v743_v34, %v688_v2 }
 0x190   :  { %928 = vrot.lane.b32.xlu0 %v2422_v58, %s1121_s2  ;;  %v596_v13 = vadd.f32 %v588_v11, %v2706_v53  ;;  %v831_v47 = vmul.f32 %v2367_v63, %v2188_v51  ;;  %v744_v9 = vmul.f32 %v2305_v18, %v1964_v52  ;;  %v597_v42 = vadd.f32 %v589_v7, %v2707_v50 }
 0x191   :  { %930 = vrot.lane.b32.xlu1 %v2429_v26, %s1121_s2  ;;  %v2442_v46 = vadd.f32 %v829_v22, %v750_v14  ;;  %v832_v45 = vmul.f32 %v2367_v63, %v2217_v59  ;;  %v2449_v8 = vadd.f32 %v830_v28, %v751_v61  ;;  %v745_v29 = vmul.f32 %v2327_v49, %v1964_v52  ;;  %v2711_v28 = vld [vmem:[#allocation13_spill] sm:$0xff]  ;;  %v2712_v61 = vld [vmem:[#allocation14_spill] sm:$0xff] }
 0x192   :  { %v691_v0 = vadd.f32 %v683_v54, %v596_v13  ;;  %v752_v51 = vadd.f32 %v744_v9, %v689_v56  ;;  %v692_v39 = vadd.f32 %v684_v1, %v597_v42  ;;  %v833_v57 = vmul.f32 %v2367_v63, %v2221_v60 }
 0x193   :  { %v753_v18 = vadd.f32 %v745_v29, %v690_v48  ;;  %v746_v59 = vmul.f32 %v2351_v38, %v1964_v52  ;;  %v834_v49 = vmul.f32 %v2367_v63, %v2259_v3  ;;  %v747_v31 = vmul.f32 %v2359_v36, %v1964_v52 }
 0x194   :  { %932 = vrot.lane.b32.xlu0 %v2442_v46, %s1121_s2  ;;  %v2459_v21 = vadd.f32 %v831_v47, %v752_v51  ;;  %v868_v52 = vstv %s867_s26  ;;  %v910_v48 = vstv %s1031_s29  ;;  %v2713_v47 = vld [vmem:[#allocation25_spill] sm:$0xff] }
 0x195   :  { %934 = vrot.lane.b32.xlu1 %v2449_v8, %s1121_s2  ;;  %v2465_v20 = vadd.f32 %v832_v45, %v753_v18  ;;  %v754_v30 = vadd.f32 %v746_v59, %v691_v0  ;;  %v755_v60 = vadd.f32 %v747_v31, %v692_v39 }
 0x197   :  { %v2473_v25 = vadd.f32 %v833_v57, %v754_v30  ;;  %v2475_v6 = vadd.f32 %v834_v49, %v755_v60 }
 0x198   :  { %936 = vrot.lane.b32.xlu0 %v2459_v21, %s1121_s2 }
 0x199   :  { %938 = vrot.lane.b32.xlu1 %v2465_v20, %s1121_s2 }
 0x19c   :  { %940 = vrot.lane.b32.xlu0 %v2473_v25, %s1121_s2 }
 0x19d   :  { %942 = vrot.lane.b32.xlu1 %v2475_v6, %s1121_s2 }
 0x1e0   :  { %v844_v3 = vpop.permute.xlu0 %843 }
 0x1e1   :  { %v859_v38 = vadd.f32 %v844_v3, %v2173_v62 }
 0x1e3   :  { %v846_v36 = vpop.permute.xlu1 %845  ;;  %v869_v5 = vadd.f32 %v868_v52, %v859_v38 }
 0x1e4   :  { %v860_v63 = vadd.f32 %v846_v36, %v2178_v35  ;;  %v848_v44 = vpop.permute.xlu0 %847  ;;  %v2708_v35 = vld [vmem:[#allocation35_spill] sm:$0xff]  ;;  %v953_v36 = vstv %s1040_s19 }
 0x1e5   :  { %877 = vst [vmem:[%s2580_s3] sm:$0xff] %v869_v5  ;;  %v861_v23 = vadd.f32 %v848_v44, %v2202_v24  ;;  %v2709_v24 = vld [vmem:[#allocation24_spill] sm:$0xff] }
 0x1e6   :  { %v870_v37 = vadd.f32 %v868_v52, %v860_v63 }
 0x1e7   :  { %v850_v10 = vpop.permute.xlu1 %849  ;;  %v871_v62 = vadd.f32 %v868_v52, %v861_v23 }
 0x1e8   :  { %878 = vst [vmem:[%s2580_s3 + $0x8] sm:$0xff] %v870_v37  ;;  %v862_v2 = vadd.f32 %v850_v10, %v2208_v15  ;;  %v852_v55 = vpop.permute.xlu0 %851 }
 0x1e9   :  { %879 = vst [vmem:[%s2580_s3 + $0x10] sm:$0xff] %v871_v62  ;;  %v863_v34 = vadd.f32 %v852_v55, %v2708_v35 }
 0x1ea   :  { %v872_v43 = vadd.f32 %v868_v52, %v862_v2 }
 0x1eb   :  { %v854_v17 = vpop.permute.xlu1 %853  ;;  %v873_v11 = vadd.f32 %v868_v52, %v863_v34 }
 0x1ec   :  { %880 = vst [vmem:[%s2580_s3 + $0x18] sm:$0xff] %v872_v43  ;;  %v864_v16 = vadd.f32 %v854_v17, %v2709_v24  ;;  %v856_v15 = vpop.permute.xlu0 %855 }
 0x1ed   :  { %881 = vst [vmem:[%s2580_s3 + $0x20] sm:$0xff] %v873_v11  ;;  %v865_v27 = vadd.f32 %v856_v15, %v2710_v4 }
 0x1ee   :  { %v874_v22 = vadd.f32 %v868_v52, %v864_v16 }
 0x1ef   :  { %v858_v7 = vpop.permute.xlu1 %857  ;;  %v875_v54 = vadd.f32 %v868_v52, %v865_v27 }
 0x1f0   :  { %882 = vst [vmem:[%s2580_s3 + $0x28] sm:$0xff] %v874_v22  ;;  %v866_v56 = vadd.f32 %v858_v7, %v2711_v28 }
 0x1f1   :  { %883 = vst [vmem:[%s2580_s3 + $0x30] sm:$0xff] %v875_v54 }
 0x1f2   :  { %v876_v14 = vadd.f32 %v868_v52, %v866_v56  ;;  %v886_v1 = vpop.permute.xlu0 %885 }
 0x1f3   :  { %v901_v53 = vadd.f32 %v886_v1, %v2712_v61  ;;  %v888_v13 = vpop.permute.xlu1 %887 }
 0x1f4   :  { %884 = vst [vmem:[%s2580_s3 + $0x38] sm:$0xff] %v876_v14  ;;  %v902_v9 = vadd.f32 %v888_v13, %v2713_v47 }
 0x1f5   :  { %v911_v50 = vadd.f32 %v910_v48, %v901_v53 }
 0x1f6   :  { %v912_v42 = vadd.f32 %v910_v48, %v902_v9  ;;  %v890_v45 = vpop.permute.xlu0 %889 }
 0x1f7   :  { %1032 = vst [vmem:[%s2580_s3 + $0x40] sm:$0xff] %v911_v50  ;;  %v903_v29 = vadd.f32 %v890_v45, %v2340_v41  ;;  %v892_v0 = vpop.permute.xlu1 %891 }
 0x1f8   :  { %1033 = vst [vmem:[%s2580_s3 + $0x48] sm:$0xff] %v912_v42  ;;  %v904_v51 = vadd.f32 %v892_v0, %v2347_v12 }
 0x1f9   :  { %v913_v39 = vadd.f32 %v910_v48, %v903_v29 }
 0x1fa   :  { %v914_v18 = vadd.f32 %v910_v48, %v904_v51  ;;  %v894_v57 = vpop.permute.xlu0 %893 }
 0x1fb   :  { %1034 = vst [vmem:[%s2580_s3 + $0x50] sm:$0xff] %v913_v39  ;;  %v905_v59 = vadd.f32 %v894_v57, %v2371_v32  ;;  %v896_v49 = vpop.permute.xlu1 %895 }
 0x1fc   :  { %1035 = vst [vmem:[%s2580_s3 + $0x58] sm:$0xff] %v914_v18  ;;  %v906_v41 = vadd.f32 %v896_v49, %v2378_v19 }
 0x1fd   :  { %v915_v31 = vadd.f32 %v910_v48, %v905_v59 }
 0x1fe   :  { %v916_v30 = vadd.f32 %v910_v48, %v906_v41  ;;  %v898_v12 = vpop.permute.xlu0 %897 }
 0x1ff   :  { %1036 = vst [vmem:[%s2580_s3 + $0x60] sm:$0xff] %v915_v31  ;;  %v907_v60 = vadd.f32 %v898_v12, %v2395_v33  ;;  %v900_v52 = vpop.permute.xlu1 %899 }
 0x200   :  { %1037 = vst [vmem:[%s2580_s3 + $0x68] sm:$0xff] %v916_v30  ;;  %v908_v32 = vadd.f32 %v900_v52, %v2402_v40 }
 0x201   :  { %v917_v3 = vadd.f32 %v910_v48, %v907_v60 }
 0x202   :  { %v918_v38 = vadd.f32 %v910_v48, %v908_v32  ;;  %v929_v19 = vpop.permute.xlu0 %928 }
 0x203   :  { %1038 = vst [vmem:[%s2580_s3 + $0x70] sm:$0xff] %v917_v3  ;;  %v944_v63 = vadd.f32 %v929_v19, %v2422_v58  ;;  %v931_v5 = vpop.permute.xlu1 %930 }
 0x204   :  { %1039 = vst [vmem:[%s2580_s3 + $0x78] sm:$0xff] %v918_v38  ;;  %v945_v33 = vadd.f32 %v931_v5, %v2429_v26 }
 0x205   :  { %v954_v37 = vadd.f32 %v953_v36, %v944_v63 }
 0x206   :  { %v955_v44 = vadd.f32 %v953_v36, %v945_v33  ;;  %v933_v40 = vpop.permute.xlu0 %932 }
 0x207   :  { %1041 = vst [vmem:[%s2580_s3 + $0x80] sm:$0xff] %v954_v37  ;;  %v946_v23 = vadd.f32 %v933_v40, %v2442_v46  ;;  %v935_v10 = vpop.permute.xlu1 %934 }
 0x208   :  { %1042 = vst [vmem:[%s2580_s3 + $0x88] sm:$0xff] %v955_v44  ;;  %v947_v58 = vadd.f32 %v935_v10, %v2449_v8 }
 0x209   :  { %v956_v2 = vadd.f32 %v953_v36, %v946_v23 }
 0x20a   :  { %v957_v62 = vadd.f32 %v953_v36, %v947_v58  ;;  %v937_v43 = vpop.permute.xlu0 %936 }
 0x20b   :  { %1043 = vst [vmem:[%s2580_s3 + $0x90] sm:$0xff] %v956_v2  ;;  %v948_v26 = vadd.f32 %v937_v43, %v2459_v21  ;;  %v939_v55 = vpop.permute.xlu1 %938 }
 0x20c   :  { %1044 = vst [vmem:[%s2580_s3 + $0x98] sm:$0xff] %v957_v62  ;;  %v949_v46 = vadd.f32 %v939_v55, %v2465_v20 }
 0x20d   :  { %v958_v35 = vadd.f32 %v953_v36, %v948_v26 }
 0x20e   :  { %v959_v34 = vadd.f32 %v953_v36, %v949_v46  ;;  %v941_v17 = vpop.permute.xlu0 %940 }
 0x20f   :  { %1045 = vst [vmem:[%s2580_s3 + $0xa0] sm:$0xff] %v958_v35  ;;  %v950_v8 = vadd.f32 %v941_v17, %v2473_v25  ;;  %v943_v24 = vpop.permute.xlu1 %942 }
 0x210   :  { %1046 = vst [vmem:[%s2580_s3 + $0xa8] sm:$0xff] %v959_v34  ;;  %v951_v21 = vadd.f32 %v943_v24, %v2475_v6 }
 0x211   :  { %v960_v16 = vadd.f32 %v953_v36, %v950_v8 }
 0x212   :  { %v961_v11 = vadd.f32 %v953_v36, %v951_v21 }
 0x213   :  { %1047 = vst [vmem:[%s2580_s3 + $0xb0] sm:$0xff] %v960_v16 }
 0x214   :  { %1048 = vst [vmem:[%s2580_s3 + $0xb8] sm:$0xff] %v961_v11 }
 0x215   :  { %975 = vsyncpa [#allocation4], 1 }
 0x216   :  { %976 = vsyncpa [#allocation5], 1 }
 0x217   :  { %977 = vsyncpa [#allocation8], 1 }

</bundles_post_ra>
